<compile_context>
chip_gen: v7x
topology: tpu7x:2x2x1
jax: 0.10.0
libtpu: 0.0.40
codegen_flags: <defaults>
</compile_context>

<pallas_src>
import jax
import jax.numpy as jnp
from jax import lax
from jax.experimental import pallas as pl
from jax.experimental.pallas import tpu as pltpu

MXU_DTYPE = jnp.bfloat16  # MXU operand dtype; accumulation stays f32.


# ----------------------------- fused kernel -----------------------------

def _fused_forward_kernel(x_ref, w1_ref, b1_ref, w2_ref, b2_ref,
                          wd1_ref, bd1_ref, wd2_ref, bd2_ref,
                          o_ref, p1_ref):
    f32 = jnp.float32

    x = x_ref[0]                                  # (16, 24, 3) NHWC, W zero-padded 16->24

    # ---- conv1 (3x3 valid, 3->64) + bias + ReLU : 9 shifted-tap dots ----
    acc1 = jnp.zeros((14 * 16, 64), f32)
    for ki in range(3):
        for kj in range(3):
            t = ki * 3 + kj
            patch = x[ki:ki + 14, kj:kj + 16, :]          # (14, 16, 3)
            patch2d = patch.reshape(14 * 16, 3)           # tile-aligned merge (16 % 8 == 0)
            acc1 = acc1 + jnp.dot(patch2d.astype(MXU_DTYPE), w1_ref[t],
                                  preferred_element_type=f32)
    y1 = jnp.maximum(acc1 + b1_ref[...], 0.0)             # (224, 64) = (14,16,64); w<14 valid

    # ---- maxpool1 2x2 (floor) -> p1_ref scratch (7, 16, 64), valid (7, 7) ----
    p1_ref[...] = jnp.zeros((7, 16, 64), f32)
    y1h = y1.reshape(7, 2, 16, 64)                        # split of major/sublane, no-op
    yh = jnp.maximum(y1h[:, 0], y1h[:, 1])                # pooled over H -> (7, 16, 64)
    for w in range(7):                                    # pool over W, compact into scratch
        p1_ref[:, w:w + 1, :] = jnp.maximum(yh[:, 2 * w:2 * w + 1, :],
                                            yh[:, 2 * w + 1:2 * w + 2, :])

    # ---- conv2 (3x3 valid, 64->64) + bias + ReLU : 9 shifted-tap dots ----
    acc2 = jnp.zeros((5 * 8, 64), f32)
    for ki in range(3):
        for kj in range(3):
            t = ki * 3 + kj
            patch = p1_ref[ki:ki + 5, kj:kj + 8, :]       # (5, 8, 64); only cols<7 feed valid outs
            patch2d = patch.reshape(5 * 8, 64)            # tile-aligned merge (8 % 8 == 0)
            acc2 = acc2 + jnp.dot(patch2d.astype(MXU_DTYPE), w2_ref[t],
                                  preferred_element_type=f32)
    y2 = jnp.maximum(acc2 + b2_ref[...], 0.0)             # (40, 64) = (5,8,64); (5,5) valid

    # ---- maxpool2 2x2 (floor) -> four (1, 64) channel vectors ----
    y2r = y2.reshape(5, 8, 64)
    r0 = jnp.maximum(y2r[0:1], y2r[1:2])                  # H rows (0,1)
    r1 = jnp.maximum(y2r[2:3], y2r[3:4])                  # H rows (2,3); row 4 dropped (floor)
    p00 = jnp.maximum(r0[:, 0:1, :], r0[:, 1:2, :]).reshape(1, 64)
    p01 = jnp.maximum(r0[:, 2:3, :], r0[:, 3:4, :]).reshape(1, 64)
    p10 = jnp.maximum(r1[:, 0:1, :], r1[:, 1:2, :]).reshape(1, 64)
    p11 = jnp.maximum(r1[:, 2:3, :], r1[:, 3:4, :]).reshape(1, 64)

    # ---- flatten + dense1 (256->64) + ReLU; NCHW flatten folded into wd1 layout ----
    h = (jnp.dot(p00.astype(MXU_DTYPE), wd1_ref[0], preferred_element_type=f32)
         + jnp.dot(p01.astype(MXU_DTYPE), wd1_ref[1], preferred_element_type=f32)
         + jnp.dot(p10.astype(MXU_DTYPE), wd1_ref[2], preferred_element_type=f32)
         + jnp.dot(p11.astype(MXU_DTYPE), wd1_ref[3], preferred_element_type=f32))
    h = jnp.maximum(h + bd1_ref[...], 0.0)                # (1, 64)

    # ---- dense2 (64->2) + softmax (dim=-1) ----
    logits = jnp.dot(h.astype(MXU_DTYPE), wd2_ref[...],
                     preferred_element_type=f32) + bd2_ref[...]
    m = jnp.max(logits, axis=-1, keepdims=True)
    e = jnp.exp(logits - m)
    probs = e / jnp.sum(e, axis=-1, keepdims=True)
    o_ref[0] = probs                                      # (1, 2)


# ----------------------------- host-side glue -----------------------------

def init_params(key):
    """PyTorch-layout parameters (out_c, in_c, kh, kw) / (out, in), fan-in scaled."""
    ks = jax.random.split(key, 8)

    def u(k, shape, fan_in):
        b = fan_in ** -0.5
        return jax.random.uniform(k, shape, jnp.float32, -b, b)

    return {
        "conv1_w": u(ks[0], (64, 3, 3, 3), 27),
        "conv1_b": u(ks[1], (64,), 27),
        "conv2_w": u(ks[2], (64, 64, 3, 3), 576),
        "conv2_b": u(ks[3], (64,), 576),
        "dense1_w": u(ks[4], (64, 256), 256),   # LazyLinear -> in_features = 64*2*2
        "dense1_b": u(ks[5], (64,), 256),
        "dense2_w": u(ks[6], (2, 64), 64),
        "dense2_b": u(ks[7], (2,), 64),
    }


def prepare_params(params):
    """One-time kernel-friendly weight layout (hoisted out of forward())."""
    w1 = params["conv1_w"].transpose(2, 3, 1, 0).reshape(9, 3, 64)    # [tap, cin, cout]
    w2 = params["conv2_w"].transpose(2, 3, 1, 0).reshape(9, 64, 64)   # [tap, cin, cout]
    wd1 = (params["dense1_w"].reshape(64, 64, 2, 2)                   # (out, c, h, w)
           .transpose(2, 3, 1, 0).reshape(4, 64, 64))                 # [(h*2+w), cin, out]
    wd2 = params["dense2_w"].T                                        # (64, 2)
    return {
        "w1": w1.astype(MXU_DTYPE), "b1": params["conv1_b"].reshape(1, 64),
        "w2": w2.astype(MXU_DTYPE), "b2": params["conv2_b"].reshape(1, 64),
        "wd1": wd1.astype(MXU_DTYPE), "bd1": params["dense1_b"].reshape(1, 64),
        "wd2": wd2.astype(MXU_DTYPE), "bd2": params["dense2_b"].reshape(1, 2),
    }


def forward(x_nchw, prep):
    N, C, H, W = x_nchw.shape
    assert (C, H, W) == (3, 16, 16), "network was instantiated for 3x16x16 inputs"
    # NCHW -> NHWC, pad W 16 -> 24 (keeps in-kernel reshapes tile aligned; pads are zero).
    x_pad = jnp.pad(jnp.transpose(x_nchw, (0, 2, 3, 1)),
                    ((0, 0), (0, 0), (0, 8), (0, 0)))

    out = pl.pallas_call(
        _fused_forward_kernel,
        out_shape=jax.ShapeDtypeStruct((N, 1, 2), jnp.float32),
        grid_spec=pltpu.PrefetchScalarGridSpec(
            num_scalar_prefetch=0,
            grid=(N,),
            in_specs=[
                pl.BlockSpec((1, 16, 24, 3), lambda n: (n, 0, 0, 0)),  # x (per sample)
                pl.BlockSpec((9, 3, 64), lambda n: (0, 0, 0)),         # conv1 taps (bf16)
                pl.BlockSpec((1, 64), lambda n: (0, 0)),               # conv1 bias
                pl.BlockSpec((9, 64, 64), lambda n: (0, 0, 0)),        # conv2 taps (bf16)
                pl.BlockSpec((1, 64), lambda n: (0, 0)),               # conv2 bias
                pl.BlockSpec((4, 64, 64), lambda n: (0, 0, 0)),        # dense1 w (bf16)
                pl.BlockSpec((1, 64), lambda n: (0, 0)),               # dense1 bias
                pl.BlockSpec((64, 2), lambda n: (0, 0)),               # dense2 w (bf16)
                pl.BlockSpec((1, 2), lambda n: (0, 0)),                # dense2 bias
            ],
            out_specs=pl.BlockSpec((1, 1, 2), lambda n: (n, 0, 0)),
            scratch_shapes=[pltpu.VMEM((7, 16, 64), jnp.float32)],     # pool1 output
        ),
        compiler_params=pltpu.CompilerParams(
            dimension_semantics=("parallel",)),
    )(x_pad, prep["w1"], prep["b1"], prep["w2"], prep["b2"],
      prep["wd1"], prep["bd1"], prep["wd2"], prep["bd2"])
    return out.reshape(N, 2)


def reference_forward(x_nchw, params):
    """Plain-JAX reference mirroring the PyTorch module (for correctness check)."""
    dn = ("NCHW", "OIHW", "NCHW")
    y = lax.conv_general_dilated(x_nchw, params["conv1_w"], (1, 1), "VALID",
                                 dimension_numbers=dn)
    y = jax.nn.relu(y + params["conv1_b"][None, :, None, None])
    y = lax.reduce_window(y, -jnp.inf, lax.max, (1, 1, 2, 2), (1, 1, 2, 2), "VALID")
    y = lax.conv_general_dilated(y, params["conv2_w"], (1, 1), "VALID",
                                 dimension_numbers=dn)
    y = jax.nn.relu(y + params["conv2_b"][None, :, None, None])
    y = lax.reduce_window(y, -jnp.inf, lax.max, (1, 1, 2, 2), (1, 1, 2, 2), "VALID")
    y = y.reshape(y.shape[0], -1)                         # NCHW flatten -> (N, 256)
    y = jax.nn.relu(y @ params["dense1_w"].T + params["dense1_b"])
    y = y @ params["dense2_w"].T + params["dense2_b"]
    return jax.nn.softmax(y, axis=-1)


if __name__ == "__main__":
    key = jax.random.PRNGKey(0)
    k_x, k_p = jax.random.split(key)
    x = jax.random.normal(k_x, (2, 3, 16, 16), jnp.float32)   # NCHW, like PyTorch
    params = init_params(k_p)
    prep = prepare_params(params)                             # one-time weight prep

    out = jax.jit(forward)(x, prep)
    out = jax.block_until_ready(out)

    assert out.shape == (2, 2)
    assert bool(jnp.all(jnp.isfinite(out)))
    assert bool(jnp.allclose(jnp.sum(out, axis=-1), 1.0, atol=1e-5))

    # Correctness vs plain-JAX reference (tolerance covers bf16 MXU operands).
    ref = reference_forward(x, params)
    assert bool(jnp.allclose(out, ref, atol=2e-2)), (out, ref)

    print("KERNEL_OK")
</pallas_src>

<mosaic_0001>
module attributes {stable_mosaic.version = 11 : i64} {
  func.func @_fused_forward_kernel(%arg0: i32, %arg1: memref<1x16x24x3xf32, #tpu.memory_space<vmem>>, %arg2: memref<9x3x64xbf16, #tpu.memory_space<vmem>>, %arg3: memref<1x64xf32, #tpu.memory_space<vmem>>, %arg4: memref<9x64x64xbf16, #tpu.memory_space<vmem>>, %arg5: memref<1x64xf32, #tpu.memory_space<vmem>>, %arg6: memref<4x64x64xbf16, #tpu.memory_space<vmem>>, %arg7: memref<1x64xf32, #tpu.memory_space<vmem>>, %arg8: memref<64x2xbf16, #tpu.memory_space<vmem>>, %arg9: memref<1x2xf32, #tpu.memory_space<vmem>>, %arg10: memref<1x1x2xf32, #tpu.memory_space<vmem>>, %arg11: memref<7x16x64xf32, #tpu.memory_space<vmem>>) attributes {dimension_semantics = [#tpu.dimension_semantics<parallel>], iteration_bounds = array<i64: 2>, scalar_prefetch = 0 : i64, scratch_operands = 1 : i64, tpu.core_type = #tpu.core_type<tc>, window_params = [{transform_indices = @transform_0, window_bounds = array<i64: 1, 16, 24, 3>}, {pipeline_mode = #tpu.pipeline_mode<synchronous>, transform_indices = @transform_1, window_bounds = array<i64: 9, 3, 64>}, {pipeline_mode = #tpu.pipeline_mode<synchronous>, transform_indices = @transform_2, window_bounds = array<i64: 1, 64>}, {pipeline_mode = #tpu.pipeline_mode<synchronous>, transform_indices = @transform_3, window_bounds = array<i64: 9, 64, 64>}, {pipeline_mode = #tpu.pipeline_mode<synchronous>, transform_indices = @transform_4, window_bounds = array<i64: 1, 64>}, {pipeline_mode = #tpu.pipeline_mode<synchronous>, transform_indices = @transform_5, window_bounds = array<i64: 4, 64, 64>}, {pipeline_mode = #tpu.pipeline_mode<synchronous>, transform_indices = @transform_6, window_bounds = array<i64: 1, 64>}, {pipeline_mode = #tpu.pipeline_mode<synchronous>, transform_indices = @transform_7, window_bounds = array<i64: 64, 2>}, {pipeline_mode = #tpu.pipeline_mode<synchronous>, transform_indices = @transform_8, window_bounds = array<i64: 1, 2>}, {transform_indices = @transform_9, window_bounds = array<i64: 1, 1, 2>}]} {
    %c0 = arith.constant 0 : index
    %c0_0 = arith.constant 0 : index
    %c0_1 = arith.constant 0 : index
    %c0_2 = arith.constant 0 : index
    %0 = vector.load %arg1[%c0, %c0_0, %c0_1, %c0_2] : memref<1x16x24x3xf32, #tpu.memory_space<vmem>>, vector<1x16x24x3xf32>
    %1 = vector.shape_cast %0 : vector<1x16x24x3xf32> to vector<16x24x3xf32>
    %cst = arith.constant 0.000000e+00 : f32
    %2 = vector.broadcast %cst : f32 to vector<224x64xf32>
    %3 = vector.extract_strided_slice %1 {offsets = [0, 0, 0], sizes = [14, 16, 3], strides = [1, 1, 1]} : vector<16x24x3xf32> to vector<14x16x3xf32>
    %4 = vector.shape_cast %3 : vector<14x16x3xf32> to vector<224x3xf32>
    %5 = arith.truncf %4 : vector<224x3xf32> to vector<224x3xbf16>
    %c0_3 = arith.constant 0 : index
    %c0_4 = arith.constant 0 : index
    %c0_5 = arith.constant 0 : index
    %6 = vector.load %arg2[%c0_3, %c0_4, %c0_5] : memref<9x3x64xbf16, #tpu.memory_space<vmem>>, vector<1x3x64xbf16>
    %7 = vector.shape_cast %6 : vector<1x3x64xbf16> to vector<3x64xbf16>
    %cst_6 = arith.constant dense<0.000000e+00> : vector<224x64xf32>
    %8 = tpu.matmul %5, %7, %cst_6 {dimension_numbers = #tpu.dot_dimension_numbers<[1], [0], [0], [1], [0, 0, 1, 1], [], []>} : vector<224x3xbf16>, vector<3x64xbf16>, vector<224x64xf32> -> vector<224x64xf32>
    %9 = arith.addf %2, %8 : vector<224x64xf32>
    %10 = vector.extract_strided_slice %1 {offsets = [0, 1, 0], sizes = [14, 16, 3], strides = [1, 1, 1]} : vector<16x24x3xf32> to vector<14x16x3xf32>
    %11 = vector.shape_cast %10 : vector<14x16x3xf32> to vector<224x3xf32>
    %12 = arith.truncf %11 : vector<224x3xf32> to vector<224x3xbf16>
    %c1 = arith.constant 1 : index
    %c0_7 = arith.constant 0 : index
    %c0_8 = arith.constant 0 : index
    %13 = vector.load %arg2[%c1, %c0_7, %c0_8] : memref<9x3x64xbf16, #tpu.memory_space<vmem>>, vector<1x3x64xbf16>
    %14 = vector.shape_cast %13 : vector<1x3x64xbf16> to vector<3x64xbf16>
    %cst_9 = arith.constant dense<0.000000e+00> : vector<224x64xf32>
    %15 = tpu.matmul %12, %14, %cst_9 {dimension_numbers = #tpu.dot_dimension_numbers<[1], [0], [0], [1], [0, 0, 1, 1], [], []>} : vector<224x3xbf16>, vector<3x64xbf16>, vector<224x64xf32> -> vector<224x64xf32>
    %16 = arith.addf %9, %15 : vector<224x64xf32>
    %17 = vector.extract_strided_slice %1 {offsets = [0, 2, 0], sizes = [14, 16, 3], strides = [1, 1, 1]} : vector<16x24x3xf32> to vector<14x16x3xf32>
    %18 = vector.shape_cast %17 : vector<14x16x3xf32> to vector<224x3xf32>
    %19 = arith.truncf %18 : vector<224x3xf32> to vector<224x3xbf16>
    %c2 = arith.constant 2 : index
    %c0_10 = arith.constant 0 : index
    %c0_11 = arith.constant 0 : index
    %20 = vector.load %arg2[%c2, %c0_10, %c0_11] : memref<9x3x64xbf16, #tpu.memory_space<vmem>>, vector<1x3x64xbf16>
    %21 = vector.shape_cast %20 : vector<1x3x64xbf16> to vector<3x64xbf16>
    %cst_12 = arith.constant dense<0.000000e+00> : vector<224x64xf32>
    %22 = tpu.matmul %19, %21, %cst_12 {dimension_numbers = #tpu.dot_dimension_numbers<[1], [0], [0], [1], [0, 0, 1, 1], [], []>} : vector<224x3xbf16>, vector<3x64xbf16>, vector<224x64xf32> -> vector<224x64xf32>
    %23 = arith.addf %16, %22 : vector<224x64xf32>
    %24 = vector.extract_strided_slice %1 {offsets = [1, 0, 0], sizes = [14, 16, 3], strides = [1, 1, 1]} : vector<16x24x3xf32> to vector<14x16x3xf32>
    %25 = vector.shape_cast %24 : vector<14x16x3xf32> to vector<224x3xf32>
    %26 = arith.truncf %25 : vector<224x3xf32> to vector<224x3xbf16>
    %c3 = arith.constant 3 : index
    %c0_13 = arith.constant 0 : index
    %c0_14 = arith.constant 0 : index
    %27 = vector.load %arg2[%c3, %c0_13, %c0_14] : memref<9x3x64xbf16, #tpu.memory_space<vmem>>, vector<1x3x64xbf16>
    %28 = vector.shape_cast %27 : vector<1x3x64xbf16> to vector<3x64xbf16>
    %cst_15 = arith.constant dense<0.000000e+00> : vector<224x64xf32>
    %29 = tpu.matmul %26, %28, %cst_15 {dimension_numbers = #tpu.dot_dimension_numbers<[1], [0], [0], [1], [0, 0, 1, 1], [], []>} : vector<224x3xbf16>, vector<3x64xbf16>, vector<224x64xf32> -> vector<224x64xf32>
    %30 = arith.addf %23, %29 : vector<224x64xf32>
    %31 = vector.extract_strided_slice %1 {offsets = [1, 1, 0], sizes = [14, 16, 3], strides = [1, 1, 1]} : vector<16x24x3xf32> to vector<14x16x3xf32>
    %32 = vector.shape_cast %31 : vector<14x16x3xf32> to vector<224x3xf32>
    %33 = arith.truncf %32 : vector<224x3xf32> to vector<224x3xbf16>
    %c4 = arith.constant 4 : index
    %c0_16 = arith.constant 0 : index
    %c0_17 = arith.constant 0 : index
    %34 = vector.load %arg2[%c4, %c0_16, %c0_17] : memref<9x3x64xbf16, #tpu.memory_space<vmem>>, vector<1x3x64xbf16>
    %35 = vector.shape_cast %34 : vector<1x3x64xbf16> to vector<3x64xbf16>
    %cst_18 = arith.constant dense<0.000000e+00> : vector<224x64xf32>
    %36 = tpu.matmul %33, %35, %cst_18 {dimension_numbers = #tpu.dot_dimension_numbers<[1], [0], [0], [1], [0, 0, 1, 1], [], []>} : vector<224x3xbf16>, vector<3x64xbf16>, vector<224x64xf32> -> vector<224x64xf32>
    %37 = arith.addf %30, %36 : vector<224x64xf32>
    %38 = vector.extract_strided_slice %1 {offsets = [1, 2, 0], sizes = [14, 16, 3], strides = [1, 1, 1]} : vector<16x24x3xf32> to vector<14x16x3xf32>
    %39 = vector.shape_cast %38 : vector<14x16x3xf32> to vector<224x3xf32>
    %40 = arith.truncf %39 : vector<224x3xf32> to vector<224x3xbf16>
    %c5 = arith.constant 5 : index
    %c0_19 = arith.constant 0 : index
    %c0_20 = arith.constant 0 : index
    %41 = vector.load %arg2[%c5, %c0_19, %c0_20] : memref<9x3x64xbf16, #tpu.memory_space<vmem>>, vector<1x3x64xbf16>
    %42 = vector.shape_cast %41 : vector<1x3x64xbf16> to vector<3x64xbf16>
    %cst_21 = arith.constant dense<0.000000e+00> : vector<224x64xf32>
    %43 = tpu.matmul %40, %42, %cst_21 {dimension_numbers = #tpu.dot_dimension_numbers<[1], [0], [0], [1], [0, 0, 1, 1], [], []>} : vector<224x3xbf16>, vector<3x64xbf16>, vector<224x64xf32> -> vector<224x64xf32>
    %44 = arith.addf %37, %43 : vector<224x64xf32>
    %45 = vector.extract_strided_slice %1 {offsets = [2, 0, 0], sizes = [14, 16, 3], strides = [1, 1, 1]} : vector<16x24x3xf32> to vector<14x16x3xf32>
    %46 = vector.shape_cast %45 : vector<14x16x3xf32> to vector<224x3xf32>
    %47 = arith.truncf %46 : vector<224x3xf32> to vector<224x3xbf16>
    %c6 = arith.constant 6 : index
    %c0_22 = arith.constant 0 : index
    %c0_23 = arith.constant 0 : index
    %48 = vector.load %arg2[%c6, %c0_22, %c0_23] : memref<9x3x64xbf16, #tpu.memory_space<vmem>>, vector<1x3x64xbf16>
    %49 = vector.shape_cast %48 : vector<1x3x64xbf16> to vector<3x64xbf16>
    %cst_24 = arith.constant dense<0.000000e+00> : vector<224x64xf32>
    %50 = tpu.matmul %47, %49, %cst_24 {dimension_numbers = #tpu.dot_dimension_numbers<[1], [0], [0], [1], [0, 0, 1, 1], [], []>} : vector<224x3xbf16>, vector<3x64xbf16>, vector<224x64xf32> -> vector<224x64xf32>
    %51 = arith.addf %44, %50 : vector<224x64xf32>
    %52 = vector.extract_strided_slice %1 {offsets = [2, 1, 0], sizes = [14, 16, 3], strides = [1, 1, 1]} : vector<16x24x3xf32> to vector<14x16x3xf32>
    %53 = vector.shape_cast %52 : vector<14x16x3xf32> to vector<224x3xf32>
    %54 = arith.truncf %53 : vector<224x3xf32> to vector<224x3xbf16>
    %c7 = arith.constant 7 : index
    %c0_25 = arith.constant 0 : index
    %c0_26 = arith.constant 0 : index
    %55 = vector.load %arg2[%c7, %c0_25, %c0_26] : memref<9x3x64xbf16, #tpu.memory_space<vmem>>, vector<1x3x64xbf16>
    %56 = vector.shape_cast %55 : vector<1x3x64xbf16> to vector<3x64xbf16>
    %cst_27 = arith.constant dense<0.000000e+00> : vector<224x64xf32>
    %57 = tpu.matmul %54, %56, %cst_27 {dimension_numbers = #tpu.dot_dimension_numbers<[1], [0], [0], [1], [0, 0, 1, 1], [], []>} : vector<224x3xbf16>, vector<3x64xbf16>, vector<224x64xf32> -> vector<224x64xf32>
    %58 = arith.addf %51, %57 : vector<224x64xf32>
    %59 = vector.extract_strided_slice %1 {offsets = [2, 2, 0], sizes = [14, 16, 3], strides = [1, 1, 1]} : vector<16x24x3xf32> to vector<14x16x3xf32>
    %60 = vector.shape_cast %59 : vector<14x16x3xf32> to vector<224x3xf32>
    %61 = arith.truncf %60 : vector<224x3xf32> to vector<224x3xbf16>
    %c8 = arith.constant 8 : index
    %c0_28 = arith.constant 0 : index
    %c0_29 = arith.constant 0 : index
    %62 = vector.load %arg2[%c8, %c0_28, %c0_29] : memref<9x3x64xbf16, #tpu.memory_space<vmem>>, vector<1x3x64xbf16>
    %63 = vector.shape_cast %62 : vector<1x3x64xbf16> to vector<3x64xbf16>
    %cst_30 = arith.constant dense<0.000000e+00> : vector<224x64xf32>
    %64 = tpu.matmul %61, %63, %cst_30 {dimension_numbers = #tpu.dot_dimension_numbers<[1], [0], [0], [1], [0, 0, 1, 1], [], []>} : vector<224x3xbf16>, vector<3x64xbf16>, vector<224x64xf32> -> vector<224x64xf32>
    %65 = arith.addf %58, %64 : vector<224x64xf32>
    %c0_31 = arith.constant 0 : index
    %c0_32 = arith.constant 0 : index
    %66 = vector.load %arg3[%c0_31, %c0_32] : memref<1x64xf32, #tpu.memory_space<vmem>>, vector<1x64xf32>
    %67 = vector.broadcast %66 : vector<1x64xf32> to vector<224x64xf32>
    %68 = arith.addf %65, %67 : vector<224x64xf32>
    %cst_33 = arith.constant 0.000000e+00 : f32
    %69 = vector.broadcast %cst_33 : f32 to vector<224x64xf32>
    %70 = arith.maximumf %68, %69 : vector<224x64xf32>
    %cst_34 = arith.constant 0.000000e+00 : f32
    %71 = vector.broadcast %cst_34 : f32 to vector<7x16x64xf32>
    %c0_35 = arith.constant 0 : index
    %c0_36 = arith.constant 0 : index
    %c0_37 = arith.constant 0 : index
    %72 = vector.load %arg11[%c0_35, %c0_36, %c0_37] : memref<7x16x64xf32, #tpu.memory_space<vmem>>, vector<7x16x64xf32>
    tpu.vector_store %arg11[%c0_35, %c0_36, %c0_37], %71 {strides = array<i32>} : memref<7x16x64xf32, #tpu.memory_space<vmem>>, vector<7x16x64xf32>,
    %73 = vector.shape_cast %70 : vector<224x64xf32> to vector<7x2x16x64xf32>
    %74 = vector.extract_strided_slice %73 {offsets = [0, 0, 0, 0], sizes = [7, 1, 16, 64], strides = [1, 1, 1, 1]} : vector<7x2x16x64xf32> to vector<7x1x16x64xf32>
    %75 = vector.shape_cast %74 : vector<7x1x16x64xf32> to vector<7x16x64xf32>
    %76 = vector.extract_strided_slice %73 {offsets = [0, 1, 0, 0], sizes = [7, 1, 16, 64], strides = [1, 1, 1, 1]} : vector<7x2x16x64xf32> to vector<7x1x16x64xf32>
    %77 = vector.shape_cast %76 : vector<7x1x16x64xf32> to vector<7x16x64xf32>
    %78 = arith.maximumf %75, %77 : vector<7x16x64xf32>
    %79 = vector.extract_strided_slice %78 {offsets = [0, 0, 0], sizes = [7, 1, 64], strides = [1, 1, 1]} : vector<7x16x64xf32> to vector<7x1x64xf32>
    %80 = vector.extract_strided_slice %78 {offsets = [0, 1, 0], sizes = [7, 1, 64], strides = [1, 1, 1]} : vector<7x16x64xf32> to vector<7x1x64xf32>
    %81 = arith.maximumf %79, %80 : vector<7x1x64xf32>
    %c0_38 = arith.constant 0 : index
    %c0_39 = arith.constant 0 : index
    %c0_40 = arith.constant 0 : index
    %82 = vector.load %arg11[%c0_38, %c0_39, %c0_40] : memref<7x16x64xf32, #tpu.memory_space<vmem>>, vector<7x1x64xf32>
    tpu.vector_store %arg11[%c0_38, %c0_39, %c0_40], %81 {strides = array<i32>} : memref<7x16x64xf32, #tpu.memory_space<vmem>>, vector<7x1x64xf32>,
    %83 = vector.extract_strided_slice %78 {offsets = [0, 2, 0], sizes = [7, 1, 64], strides = [1, 1, 1]} : vector<7x16x64xf32> to vector<7x1x64xf32>
    %84 = vector.extract_strided_slice %78 {offsets = [0, 3, 0], sizes = [7, 1, 64], strides = [1, 1, 1]} : vector<7x16x64xf32> to vector<7x1x64xf32>
    %85 = arith.maximumf %83, %84 : vector<7x1x64xf32>
    %c0_41 = arith.constant 0 : index
    %c1_42 = arith.constant 1 : index
    %c0_43 = arith.constant 0 : index
    %86 = vector.load %arg11[%c0_41, %c1_42, %c0_43] : memref<7x16x64xf32, #tpu.memory_space<vmem>>, vector<7x1x64xf32>
    tpu.vector_store %arg11[%c0_41, %c1_42, %c0_43], %85 {strides = array<i32>} : memref<7x16x64xf32, #tpu.memory_space<vmem>>, vector<7x1x64xf32>,
    %87 = vector.extract_strided_slice %78 {offsets = [0, 4, 0], sizes = [7, 1, 64], strides = [1, 1, 1]} : vector<7x16x64xf32> to vector<7x1x64xf32>
    %88 = vector.extract_strided_slice %78 {offsets = [0, 5, 0], sizes = [7, 1, 64], strides = [1, 1, 1]} : vector<7x16x64xf32> to vector<7x1x64xf32>
    %89 = arith.maximumf %87, %88 : vector<7x1x64xf32>
    %c0_44 = arith.constant 0 : index
    %c2_45 = arith.constant 2 : index
    %c0_46 = arith.constant 0 : index
    %90 = vector.load %arg11[%c0_44, %c2_45, %c0_46] : memref<7x16x64xf32, #tpu.memory_space<vmem>>, vector<7x1x64xf32>
    tpu.vector_store %arg11[%c0_44, %c2_45, %c0_46], %89 {strides = array<i32>} : memref<7x16x64xf32, #tpu.memory_space<vmem>>, vector<7x1x64xf32>,
    %91 = vector.extract_strided_slice %78 {offsets = [0, 6, 0], sizes = [7, 1, 64], strides = [1, 1, 1]} : vector<7x16x64xf32> to vector<7x1x64xf32>
    %92 = vector.extract_strided_slice %78 {offsets = [0, 7, 0], sizes = [7, 1, 64], strides = [1, 1, 1]} : vector<7x16x64xf32> to vector<7x1x64xf32>
    %93 = arith.maximumf %91, %92 : vector<7x1x64xf32>
    %c0_47 = arith.constant 0 : index
    %c3_48 = arith.constant 3 : index
    %c0_49 = arith.constant 0 : index
    %94 = vector.load %arg11[%c0_47, %c3_48, %c0_49] : memref<7x16x64xf32, #tpu.memory_space<vmem>>, vector<7x1x64xf32>
    tpu.vector_store %arg11[%c0_47, %c3_48, %c0_49], %93 {strides = array<i32>} : memref<7x16x64xf32, #tpu.memory_space<vmem>>, vector<7x1x64xf32>,
    %95 = vector.extract_strided_slice %78 {offsets = [0, 8, 0], sizes = [7, 1, 64], strides = [1, 1, 1]} : vector<7x16x64xf32> to vector<7x1x64xf32>
    %96 = vector.extract_strided_slice %78 {offsets = [0, 9, 0], sizes = [7, 1, 64], strides = [1, 1, 1]} : vector<7x16x64xf32> to vector<7x1x64xf32>
    %97 = arith.maximumf %95, %96 : vector<7x1x64xf32>
    %c0_50 = arith.constant 0 : index
    %c4_51 = arith.constant 4 : index
    %c0_52 = arith.constant 0 : index
    %98 = vector.load %arg11[%c0_50, %c4_51, %c0_52] : memref<7x16x64xf32, #tpu.memory_space<vmem>>, vector<7x1x64xf32>
    tpu.vector_store %arg11[%c0_50, %c4_51, %c0_52], %97 {strides = array<i32>} : memref<7x16x64xf32, #tpu.memory_space<vmem>>, vector<7x1x64xf32>,
    %99 = vector.extract_strided_slice %78 {offsets = [0, 10, 0], sizes = [7, 1, 64], strides = [1, 1, 1]} : vector<7x16x64xf32> to vector<7x1x64xf32>
    %100 = vector.extract_strided_slice %78 {offsets = [0, 11, 0], sizes = [7, 1, 64], strides = [1, 1, 1]} : vector<7x16x64xf32> to vector<7x1x64xf32>
    %101 = arith.maximumf %99, %100 : vector<7x1x64xf32>
    %c0_53 = arith.constant 0 : index
    %c5_54 = arith.constant 5 : index
    %c0_55 = arith.constant 0 : index
    %102 = vector.load %arg11[%c0_53, %c5_54, %c0_55] : memref<7x16x64xf32, #tpu.memory_space<vmem>>, vector<7x1x64xf32>
    tpu.vector_store %arg11[%c0_53, %c5_54, %c0_55], %101 {strides = array<i32>} : memref<7x16x64xf32, #tpu.memory_space<vmem>>, vector<7x1x64xf32>,
    %103 = vector.extract_strided_slice %78 {offsets = [0, 12, 0], sizes = [7, 1, 64], strides = [1, 1, 1]} : vector<7x16x64xf32> to vector<7x1x64xf32>
    %104 = vector.extract_strided_slice %78 {offsets = [0, 13, 0], sizes = [7, 1, 64], strides = [1, 1, 1]} : vector<7x16x64xf32> to vector<7x1x64xf32>
    %105 = arith.maximumf %103, %104 : vector<7x1x64xf32>
    %c0_56 = arith.constant 0 : index
    %c6_57 = arith.constant 6 : index
    %c0_58 = arith.constant 0 : index
    %106 = vector.load %arg11[%c0_56, %c6_57, %c0_58] : memref<7x16x64xf32, #tpu.memory_space<vmem>>, vector<7x1x64xf32>
    tpu.vector_store %arg11[%c0_56, %c6_57, %c0_58], %105 {strides = array<i32>} : memref<7x16x64xf32, #tpu.memory_space<vmem>>, vector<7x1x64xf32>,
    %cst_59 = arith.constant 0.000000e+00 : f32
    %107 = vector.broadcast %cst_59 : f32 to vector<40x64xf32>
    %c0_60 = arith.constant 0 : index
    %c0_61 = arith.constant 0 : index
    %c0_62 = arith.constant 0 : index
    %108 = vector.load %arg11[%c0_60, %c0_61, %c0_62] : memref<7x16x64xf32, #tpu.memory_space<vmem>>, vector<5x8x64xf32>
    %109 = vector.shape_cast %108 : vector<5x8x64xf32> to vector<40x64xf32>
    %110 = arith.truncf %109 : vector<40x64xf32> to vector<40x64xbf16>
    %c0_63 = arith.constant 0 : index
    %c0_64 = arith.constant 0 : index
    %c0_65 = arith.constant 0 : index
    %111 = vector.load %arg4[%c0_63, %c0_64, %c0_65] : memref<9x64x64xbf16, #tpu.memory_space<vmem>>, vector<1x64x64xbf16>
    %112 = vector.shape_cast %111 : vector<1x64x64xbf16> to vector<64x64xbf16>
    %cst_66 = arith.constant dense<0.000000e+00> : vector<40x64xf32>
    %113 = tpu.matmul %110, %112, %cst_66 {dimension_numbers = #tpu.dot_dimension_numbers<[1], [0], [0], [1], [0, 0, 1, 1], [], []>} : vector<40x64xbf16>, vector<64x64xbf16>, vector<40x64xf32> -> vector<40x64xf32>
    %114 = arith.addf %107, %113 : vector<40x64xf32>
    %c0_67 = arith.constant 0 : index
    %c1_68 = arith.constant 1 : index
    %c0_69 = arith.constant 0 : index
    %115 = vector.load %arg11[%c0_67, %c1_68, %c0_69] : memref<7x16x64xf32, #tpu.memory_space<vmem>>, vector<5x8x64xf32>
    %116 = vector.shape_cast %115 : vector<5x8x64xf32> to vector<40x64xf32>
    %117 = arith.truncf %116 : vector<40x64xf32> to vector<40x64xbf16>
    %c1_70 = arith.constant 1 : index
    %c0_71 = arith.constant 0 : index
    %c0_72 = arith.constant 0 : index
    %118 = vector.load %arg4[%c1_70, %c0_71, %c0_72] : memref<9x64x64xbf16, #tpu.memory_space<vmem>>, vector<1x64x64xbf16>
    %119 = vector.shape_cast %118 : vector<1x64x64xbf16> to vector<64x64xbf16>
    %cst_73 = arith.constant dense<0.000000e+00> : vector<40x64xf32>
    %120 = tpu.matmul %117, %119, %cst_73 {dimension_numbers = #tpu.dot_dimension_numbers<[1], [0], [0], [1], [0, 0, 1, 1], [], []>} : vector<40x64xbf16>, vector<64x64xbf16>, vector<40x64xf32> -> vector<40x64xf32>
    %121 = arith.addf %114, %120 : vector<40x64xf32>
    %c0_74 = arith.constant 0 : index
    %c2_75 = arith.constant 2 : index
    %c0_76 = arith.constant 0 : index
    %122 = vector.load %arg11[%c0_74, %c2_75, %c0_76] : memref<7x16x64xf32, #tpu.memory_space<vmem>>, vector<5x8x64xf32>
    %123 = vector.shape_cast %122 : vector<5x8x64xf32> to vector<40x64xf32>
    %124 = arith.truncf %123 : vector<40x64xf32> to vector<40x64xbf16>
    %c2_77 = arith.constant 2 : index
    %c0_78 = arith.constant 0 : index
    %c0_79 = arith.constant 0 : index
    %125 = vector.load %arg4[%c2_77, %c0_78, %c0_79] : memref<9x64x64xbf16, #tpu.memory_space<vmem>>, vector<1x64x64xbf16>
    %126 = vector.shape_cast %125 : vector<1x64x64xbf16> to vector<64x64xbf16>
    %cst_80 = arith.constant dense<0.000000e+00> : vector<40x64xf32>
    %127 = tpu.matmul %124, %126, %cst_80 {dimension_numbers = #tpu.dot_dimension_numbers<[1], [0], [0], [1], [0, 0, 1, 1], [], []>} : vector<40x64xbf16>, vector<64x64xbf16>, vector<40x64xf32> -> vector<40x64xf32>
    %128 = arith.addf %121, %127 : vector<40x64xf32>
    %c1_81 = arith.constant 1 : index
    %c0_82 = arith.constant 0 : index
    %c0_83 = arith.constant 0 : index
    %129 = vector.load %arg11[%c1_81, %c0_82, %c0_83] : memref<7x16x64xf32, #tpu.memory_space<vmem>>, vector<5x8x64xf32>
    %130 = vector.shape_cast %129 : vector<5x8x64xf32> to vector<40x64xf32>
    %131 = arith.truncf %130 : vector<40x64xf32> to vector<40x64xbf16>
    %c3_84 = arith.constant 3 : index
    %c0_85 = arith.constant 0 : index
    %c0_86 = arith.constant 0 : index
    %132 = vector.load %arg4[%c3_84, %c0_85, %c0_86] : memref<9x64x64xbf16, #tpu.memory_space<vmem>>, vector<1x64x64xbf16>
    %133 = vector.shape_cast %132 : vector<1x64x64xbf16> to vector<64x64xbf16>
    %cst_87 = arith.constant dense<0.000000e+00> : vector<40x64xf32>
    %134 = tpu.matmul %131, %133, %cst_87 {dimension_numbers = #tpu.dot_dimension_numbers<[1], [0], [0], [1], [0, 0, 1, 1], [], []>} : vector<40x64xbf16>, vector<64x64xbf16>, vector<40x64xf32> -> vector<40x64xf32>
    %135 = arith.addf %128, %134 : vector<40x64xf32>
    %c1_88 = arith.constant 1 : index
    %c1_89 = arith.constant 1 : index
    %c0_90 = arith.constant 0 : index
    %136 = vector.load %arg11[%c1_88, %c1_89, %c0_90] : memref<7x16x64xf32, #tpu.memory_space<vmem>>, vector<5x8x64xf32>
    %137 = vector.shape_cast %136 : vector<5x8x64xf32> to vector<40x64xf32>
    %138 = arith.truncf %137 : vector<40x64xf32> to vector<40x64xbf16>
    %c4_91 = arith.constant 4 : index
    %c0_92 = arith.constant 0 : index
    %c0_93 = arith.constant 0 : index
    %139 = vector.load %arg4[%c4_91, %c0_92, %c0_93] : memref<9x64x64xbf16, #tpu.memory_space<vmem>>, vector<1x64x64xbf16>
    %140 = vector.shape_cast %139 : vector<1x64x64xbf16> to vector<64x64xbf16>
    %cst_94 = arith.constant dense<0.000000e+00> : vector<40x64xf32>
    %141 = tpu.matmul %138, %140, %cst_94 {dimension_numbers = #tpu.dot_dimension_numbers<[1], [0], [0], [1], [0, 0, 1, 1], [], []>} : vector<40x64xbf16>, vector<64x64xbf16>, vector<40x64xf32> -> vector<40x64xf32>
    %142 = arith.addf %135, %141 : vector<40x64xf32>
    %c1_95 = arith.constant 1 : index
    %c2_96 = arith.constant 2 : index
    %c0_97 = arith.constant 0 : index
    %143 = vector.load %arg11[%c1_95, %c2_96, %c0_97] : memref<7x16x64xf32, #tpu.memory_space<vmem>>, vector<5x8x64xf32>
    %144 = vector.shape_cast %143 : vector<5x8x64xf32> to vector<40x64xf32>
    %145 = arith.truncf %144 : vector<40x64xf32> to vector<40x64xbf16>
    %c5_98 = arith.constant 5 : index
    %c0_99 = arith.constant 0 : index
    %c0_100 = arith.constant 0 : index
    %146 = vector.load %arg4[%c5_98, %c0_99, %c0_100] : memref<9x64x64xbf16, #tpu.memory_space<vmem>>, vector<1x64x64xbf16>
    %147 = vector.shape_cast %146 : vector<1x64x64xbf16> to vector<64x64xbf16>
    %cst_101 = arith.constant dense<0.000000e+00> : vector<40x64xf32>
    %148 = tpu.matmul %145, %147, %cst_101 {dimension_numbers = #tpu.dot_dimension_numbers<[1], [0], [0], [1], [0, 0, 1, 1], [], []>} : vector<40x64xbf16>, vector<64x64xbf16>, vector<40x64xf32> -> vector<40x64xf32>
    %149 = arith.addf %142, %148 : vector<40x64xf32>
    %c2_102 = arith.constant 2 : index
    %c0_103 = arith.constant 0 : index
    %c0_104 = arith.constant 0 : index
    %150 = vector.load %arg11[%c2_102, %c0_103, %c0_104] : memref<7x16x64xf32, #tpu.memory_space<vmem>>, vector<5x8x64xf32>
    %151 = vector.shape_cast %150 : vector<5x8x64xf32> to vector<40x64xf32>
    %152 = arith.truncf %151 : vector<40x64xf32> to vector<40x64xbf16>
    %c6_105 = arith.constant 6 : index
    %c0_106 = arith.constant 0 : index
    %c0_107 = arith.constant 0 : index
    %153 = vector.load %arg4[%c6_105, %c0_106, %c0_107] : memref<9x64x64xbf16, #tpu.memory_space<vmem>>, vector<1x64x64xbf16>
    %154 = vector.shape_cast %153 : vector<1x64x64xbf16> to vector<64x64xbf16>
    %cst_108 = arith.constant dense<0.000000e+00> : vector<40x64xf32>
    %155 = tpu.matmul %152, %154, %cst_108 {dimension_numbers = #tpu.dot_dimension_numbers<[1], [0], [0], [1], [0, 0, 1, 1], [], []>} : vector<40x64xbf16>, vector<64x64xbf16>, vector<40x64xf32> -> vector<40x64xf32>
    %156 = arith.addf %149, %155 : vector<40x64xf32>
    %c2_109 = arith.constant 2 : index
    %c1_110 = arith.constant 1 : index
    %c0_111 = arith.constant 0 : index
    %157 = vector.load %arg11[%c2_109, %c1_110, %c0_111] : memref<7x16x64xf32, #tpu.memory_space<vmem>>, vector<5x8x64xf32>
    %158 = vector.shape_cast %157 : vector<5x8x64xf32> to vector<40x64xf32>
    %159 = arith.truncf %158 : vector<40x64xf32> to vector<40x64xbf16>
    %c7_112 = arith.constant 7 : index
    %c0_113 = arith.constant 0 : index
    %c0_114 = arith.constant 0 : index
    %160 = vector.load %arg4[%c7_112, %c0_113, %c0_114] : memref<9x64x64xbf16, #tpu.memory_space<vmem>>, vector<1x64x64xbf16>
    %161 = vector.shape_cast %160 : vector<1x64x64xbf16> to vector<64x64xbf16>
    %cst_115 = arith.constant dense<0.000000e+00> : vector<40x64xf32>
    %162 = tpu.matmul %159, %161, %cst_115 {dimension_numbers = #tpu.dot_dimension_numbers<[1], [0], [0], [1], [0, 0, 1, 1], [], []>} : vector<40x64xbf16>, vector<64x64xbf16>, vector<40x64xf32> -> vector<40x64xf32>
    %163 = arith.addf %156, %162 : vector<40x64xf32>
    %c2_116 = arith.constant 2 : index
    %c2_117 = arith.constant 2 : index
    %c0_118 = arith.constant 0 : index
    %164 = vector.load %arg11[%c2_116, %c2_117, %c0_118] : memref<7x16x64xf32, #tpu.memory_space<vmem>>, vector<5x8x64xf32>
    %165 = vector.shape_cast %164 : vector<5x8x64xf32> to vector<40x64xf32>
    %166 = arith.truncf %165 : vector<40x64xf32> to vector<40x64xbf16>
    %c8_119 = arith.constant 8 : index
    %c0_120 = arith.constant 0 : index
    %c0_121 = arith.constant 0 : index
    %167 = vector.load %arg4[%c8_119, %c0_120, %c0_121] : memref<9x64x64xbf16, #tpu.memory_space<vmem>>, vector<1x64x64xbf16>
    %168 = vector.shape_cast %167 : vector<1x64x64xbf16> to vector<64x64xbf16>
    %cst_122 = arith.constant dense<0.000000e+00> : vector<40x64xf32>
    %169 = tpu.matmul %166, %168, %cst_122 {dimension_numbers = #tpu.dot_dimension_numbers<[1], [0], [0], [1], [0, 0, 1, 1], [], []>} : vector<40x64xbf16>, vector<64x64xbf16>, vector<40x64xf32> -> vector<40x64xf32>
    %170 = arith.addf %163, %169 : vector<40x64xf32>
    %c0_123 = arith.constant 0 : index
    %c0_124 = arith.constant 0 : index
    %171 = vector.load %arg5[%c0_123, %c0_124] : memref<1x64xf32, #tpu.memory_space<vmem>>, vector<1x64xf32>
    %172 = vector.broadcast %171 : vector<1x64xf32> to vector<40x64xf32>
    %173 = arith.addf %170, %172 : vector<40x64xf32>
    %cst_125 = arith.constant 0.000000e+00 : f32
    %174 = vector.broadcast %cst_125 : f32 to vector<40x64xf32>
    %175 = arith.maximumf %173, %174 : vector<40x64xf32>
    %176 = vector.shape_cast %175 : vector<40x64xf32> to vector<5x8x64xf32>
    %177 = vector.extract_strided_slice %176 {offsets = [0, 0, 0], sizes = [1, 8, 64], strides = [1, 1, 1]} : vector<5x8x64xf32> to vector<1x8x64xf32>
    %178 = vector.extract_strided_slice %176 {offsets = [1, 0, 0], sizes = [1, 8, 64], strides = [1, 1, 1]} : vector<5x8x64xf32> to vector<1x8x64xf32>
    %179 = arith.maximumf %177, %178 : vector<1x8x64xf32>
    %180 = vector.extract_strided_slice %176 {offsets = [2, 0, 0], sizes = [1, 8, 64], strides = [1, 1, 1]} : vector<5x8x64xf32> to vector<1x8x64xf32>
    %181 = vector.extract_strided_slice %176 {offsets = [3, 0, 0], sizes = [1, 8, 64], strides = [1, 1, 1]} : vector<5x8x64xf32> to vector<1x8x64xf32>
    %182 = arith.maximumf %180, %181 : vector<1x8x64xf32>
    %183 = vector.extract_strided_slice %179 {offsets = [0, 0, 0], sizes = [1, 1, 64], strides = [1, 1, 1]} : vector<1x8x64xf32> to vector<1x1x64xf32>
    %184 = vector.extract_strided_slice %179 {offsets = [0, 1, 0], sizes = [1, 1, 64], strides = [1, 1, 1]} : vector<1x8x64xf32> to vector<1x1x64xf32>
    %185 = arith.maximumf %183, %184 : vector<1x1x64xf32>
    %186 = vector.shape_cast %185 : vector<1x1x64xf32> to vector<1x64xf32>
    %187 = vector.extract_strided_slice %179 {offsets = [0, 2, 0], sizes = [1, 1, 64], strides = [1, 1, 1]} : vector<1x8x64xf32> to vector<1x1x64xf32>
    %188 = vector.extract_strided_slice %179 {offsets = [0, 3, 0], sizes = [1, 1, 64], strides = [1, 1, 1]} : vector<1x8x64xf32> to vector<1x1x64xf32>
    %189 = arith.maximumf %187, %188 : vector<1x1x64xf32>
    %190 = vector.shape_cast %189 : vector<1x1x64xf32> to vector<1x64xf32>
    %191 = vector.extract_strided_slice %182 {offsets = [0, 0, 0], sizes = [1, 1, 64], strides = [1, 1, 1]} : vector<1x8x64xf32> to vector<1x1x64xf32>
    %192 = vector.extract_strided_slice %182 {offsets = [0, 1, 0], sizes = [1, 1, 64], strides = [1, 1, 1]} : vector<1x8x64xf32> to vector<1x1x64xf32>
    %193 = arith.maximumf %191, %192 : vector<1x1x64xf32>
    %194 = vector.shape_cast %193 : vector<1x1x64xf32> to vector<1x64xf32>
    %195 = vector.extract_strided_slice %182 {offsets = [0, 2, 0], sizes = [1, 1, 64], strides = [1, 1, 1]} : vector<1x8x64xf32> to vector<1x1x64xf32>
    %196 = vector.extract_strided_slice %182 {offsets = [0, 3, 0], sizes = [1, 1, 64], strides = [1, 1, 1]} : vector<1x8x64xf32> to vector<1x1x64xf32>
    %197 = arith.maximumf %195, %196 : vector<1x1x64xf32>
    %198 = vector.shape_cast %197 : vector<1x1x64xf32> to vector<1x64xf32>
    %199 = arith.truncf %186 : vector<1x64xf32> to vector<1x64xbf16>
    %c0_126 = arith.constant 0 : index
    %c0_127 = arith.constant 0 : index
    %c0_128 = arith.constant 0 : index
    %200 = vector.load %arg6[%c0_126, %c0_127, %c0_128] : memref<4x64x64xbf16, #tpu.memory_space<vmem>>, vector<1x64x64xbf16>
    %201 = vector.shape_cast %200 : vector<1x64x64xbf16> to vector<64x64xbf16>
    %cst_129 = arith.constant dense<0.000000e+00> : vector<1x64xf32>
    %202 = tpu.matmul %199, %201, %cst_129 {dimension_numbers = #tpu.dot_dimension_numbers<[1], [0], [0], [1], [0, 0, 1, 1], [], []>} : vector<1x64xbf16>, vector<64x64xbf16>, vector<1x64xf32> -> vector<1x64xf32>
    %203 = arith.truncf %190 : vector<1x64xf32> to vector<1x64xbf16>
    %c1_130 = arith.constant 1 : index
    %c0_131 = arith.constant 0 : index
    %c0_132 = arith.constant 0 : index
    %204 = vector.load %arg6[%c1_130, %c0_131, %c0_132] : memref<4x64x64xbf16, #tpu.memory_space<vmem>>, vector<1x64x64xbf16>
    %205 = vector.shape_cast %204 : vector<1x64x64xbf16> to vector<64x64xbf16>
    %cst_133 = arith.constant dense<0.000000e+00> : vector<1x64xf32>
    %206 = tpu.matmul %203, %205, %cst_133 {dimension_numbers = #tpu.dot_dimension_numbers<[1], [0], [0], [1], [0, 0, 1, 1], [], []>} : vector<1x64xbf16>, vector<64x64xbf16>, vector<1x64xf32> -> vector<1x64xf32>
    %207 = arith.addf %202, %206 : vector<1x64xf32>
    %208 = arith.truncf %194 : vector<1x64xf32> to vector<1x64xbf16>
    %c2_134 = arith.constant 2 : index
    %c0_135 = arith.constant 0 : index
    %c0_136 = arith.constant 0 : index
    %209 = vector.load %arg6[%c2_134, %c0_135, %c0_136] : memref<4x64x64xbf16, #tpu.memory_space<vmem>>, vector<1x64x64xbf16>
    %210 = vector.shape_cast %209 : vector<1x64x64xbf16> to vector<64x64xbf16>
    %cst_137 = arith.constant dense<0.000000e+00> : vector<1x64xf32>
    %211 = tpu.matmul %208, %210, %cst_137 {dimension_numbers = #tpu.dot_dimension_numbers<[1], [0], [0], [1], [0, 0, 1, 1], [], []>} : vector<1x64xbf16>, vector<64x64xbf16>, vector<1x64xf32> -> vector<1x64xf32>
    %212 = arith.addf %207, %211 : vector<1x64xf32>
    %213 = arith.truncf %198 : vector<1x64xf32> to vector<1x64xbf16>
    %c3_138 = arith.constant 3 : index
    %c0_139 = arith.constant 0 : index
    %c0_140 = arith.constant 0 : index
    %214 = vector.load %arg6[%c3_138, %c0_139, %c0_140] : memref<4x64x64xbf16, #tpu.memory_space<vmem>>, vector<1x64x64xbf16>
    %215 = vector.shape_cast %214 : vector<1x64x64xbf16> to vector<64x64xbf16>
    %cst_141 = arith.constant dense<0.000000e+00> : vector<1x64xf32>
    %216 = tpu.matmul %213, %215, %cst_141 {dimension_numbers = #tpu.dot_dimension_numbers<[1], [0], [0], [1], [0, 0, 1, 1], [], []>} : vector<1x64xbf16>, vector<64x64xbf16>, vector<1x64xf32> -> vector<1x64xf32>
    %217 = arith.addf %212, %216 : vector<1x64xf32>
    %c0_142 = arith.constant 0 : index
    %c0_143 = arith.constant 0 : index
    %218 = vector.load %arg7[%c0_142, %c0_143] : memref<1x64xf32, #tpu.memory_space<vmem>>, vector<1x64xf32>
    %219 = arith.addf %217, %218 : vector<1x64xf32>
    %cst_144 = arith.constant 0.000000e+00 : f32
    %220 = vector.broadcast %cst_144 : f32 to vector<1x64xf32>
    %221 = arith.maximumf %219, %220 : vector<1x64xf32>
    %222 = arith.truncf %221 : vector<1x64xf32> to vector<1x64xbf16>
    %c0_145 = arith.constant 0 : index
    %c0_146 = arith.constant 0 : index
    %223 = vector.load %arg8[%c0_145, %c0_146] : memref<64x2xbf16, #tpu.memory_space<vmem>>, vector<64x2xbf16>
    %cst_147 = arith.constant dense<0.000000e+00> : vector<1x2xf32>
    %224 = tpu.matmul %222, %223, %cst_147 {dimension_numbers = #tpu.dot_dimension_numbers<[1], [0], [0], [1], [0, 0, 1, 1], [], []>} : vector<1x64xbf16>, vector<64x2xbf16>, vector<1x2xf32> -> vector<1x2xf32>
    %c0_148 = arith.constant 0 : index
    %c0_149 = arith.constant 0 : index
    %225 = vector.load %arg9[%c0_148, %c0_149] : memref<1x2xf32, #tpu.memory_space<vmem>>, vector<1x2xf32>
    %226 = arith.addf %224, %225 : vector<1x2xf32>
    %cst_150 = arith.constant dense<0xFF800000> : vector<1xf32>
    %227 = vector.multi_reduction <maximumf>, %226, %cst_150 [1] : vector<1x2xf32> to vector<1xf32>
    %228 = vector.shape_cast %227 : vector<1xf32> to vector<1x1xf32>
    %229 = vector.broadcast %228 : vector<1x1xf32> to vector<1x2xf32>
    %230 = arith.subf %226, %229 : vector<1x2xf32>
    %231 = math.exp %230 : vector<1x2xf32>
    %cst_151 = arith.constant dense<0.000000e+00> : vector<1xf32>
    %232 = vector.multi_reduction <add>, %231, %cst_151 [1] : vector<1x2xf32> to vector<1xf32>
    %233 = vector.shape_cast %232 : vector<1xf32> to vector<1x1xf32>
    %234 = vector.broadcast %233 : vector<1x1xf32> to vector<1x2xf32>
    %235 = arith.divf %231, %234 : vector<1x2xf32>
    %c0_152 = arith.constant 0 : index
    %c0_153 = arith.constant 0 : index
    %c0_154 = arith.constant 0 : index
    %236 = vector.load %arg10[%c0_152, %c0_153, %c0_154] : memref<1x1x2xf32, #tpu.memory_space<vmem>>, vector<1x1x2xf32>
    %237 = vector.shape_cast %236 : vector<1x1x2xf32> to vector<1x2xf32>
    %238 = vector.shape_cast %235 : vector<1x2xf32> to vector<1x1x2xf32>
    tpu.vector_store %arg10[%c0_152, %c0_153, %c0_154], %238 {strides = array<i32>} : memref<1x1x2xf32, #tpu.memory_space<vmem>>, vector<1x1x2xf32>,
    return
  }
  func.func @transform_0(%arg0: i32) -> (i32, i32, i32, i32) {
    %c0_i32 = arith.constant 0 : i32
    %c0_i32_0 = arith.constant 0 : i32
    %c0_i32_1 = arith.constant 0 : i32
    %c0_i32_2 = arith.constant 0 : i32
    return %arg0, %c0_i32, %c0_i32_0, %c0_i32_1 : i32, i32, i32, i32
  }
  func.func @transform_1(%arg0: i32) -> (i32, i32, i32) {
    %c0_i32 = arith.constant 0 : i32
    %c0_i32_0 = arith.constant 0 : i32
    %c0_i32_1 = arith.constant 0 : i32
    %c0_i32_2 = arith.constant 0 : i32
    return %c0_i32, %c0_i32_0, %c0_i32_1 : i32, i32, i32
  }
  func.func @transform_2(%arg0: i32) -> (i32, i32) {
    %c0_i32 = arith.constant 0 : i32
    %c0_i32_0 = arith.constant 0 : i32
    %c0_i32_1 = arith.constant 0 : i32
    return %c0_i32, %c0_i32_0 : i32, i32
  }
  func.func @transform_3(%arg0: i32) -> (i32, i32, i32) {
    %c0_i32 = arith.constant 0 : i32
    %c0_i32_0 = arith.constant 0 : i32
    %c0_i32_1 = arith.constant 0 : i32
    %c0_i32_2 = arith.constant 0 : i32
    return %c0_i32, %c0_i32_0, %c0_i32_1 : i32, i32, i32
  }
  func.func @transform_4(%arg0: i32) -> (i32, i32) {
    %c0_i32 = arith.constant 0 : i32
    %c0_i32_0 = arith.constant 0 : i32
    %c0_i32_1 = arith.constant 0 : i32
    return %c0_i32, %c0_i32_0 : i32, i32
  }
  func.func @transform_5(%arg0: i32) -> (i32, i32, i32) {
    %c0_i32 = arith.constant 0 : i32
    %c0_i32_0 = arith.constant 0 : i32
    %c0_i32_1 = arith.constant 0 : i32
    %c0_i32_2 = arith.constant 0 : i32
    return %c0_i32, %c0_i32_0, %c0_i32_1 : i32, i32, i32
  }
  func.func @transform_6(%arg0: i32) -> (i32, i32) {
    %c0_i32 = arith.constant 0 : i32
    %c0_i32_0 = arith.constant 0 : i32
    %c0_i32_1 = arith.constant 0 : i32
    return %c0_i32, %c0_i32_0 : i32, i32
  }
  func.func @transform_7(%arg0: i32) -> (i32, i32) {
    %c0_i32 = arith.constant 0 : i32
    %c0_i32_0 = arith.constant 0 : i32
    %c0_i32_1 = arith.constant 0 : i32
    return %c0_i32, %c0_i32_0 : i32, i32
  }
  func.func @transform_8(%arg0: i32) -> (i32, i32) {
    %c0_i32 = arith.constant 0 : i32
    %c0_i32_0 = arith.constant 0 : i32
    %c0_i32_1 = arith.constant 0 : i32
    return %c0_i32, %c0_i32_0 : i32, i32
  }
  func.func @transform_9(%arg0: i32) -> (i32, i32, i32) {
    %c0_i32 = arith.constant 0 : i32
    %c0_i32_0 = arith.constant 0 : i32
    %c0_i32_1 = arith.constant 0 : i32
    return %arg0, %c0_i32, %c0_i32_0 : i32, i32, i32
  }
}

</mosaic_0001>

<bundles_post_ra>
// kernel: forward.1
= control target key start
LH: loop header
LB: loop body
LE: loop exit
PB: predicated region body
PF: predicated region fallthrough
CT: control target
= control target key end

     0   :  { %14 = vsyncpa [#allocation4], 0  ;;  %s6997_s0 = inlined_call_operand.vmem [shape: f32[2,16,24,3], index: 0, kind: input, shape index: {}]   ;;  %s6998_s1 = inlined_call_operand.vmem [shape: bf16[9,3,64], index: 1, kind: input, shape index: {}]   ;;  %s6999_s2 = inlined_call_operand.vmem [shape: f32[1,64], index: 2, kind: input, shape index: {}]   ;;  %s7000_s3 = inlined_call_operand.vmem [shape: bf16[9,64,64], index: 3, kind: input, shape index: {}]   ;;  %s7001_s4 = inlined_call_operand.vmem [shape: f32[1,64], index: 4, kind: input, shape index: {}]   ;;  %s7002_s5 = inlined_call_operand.vmem [shape: bf16[4,64,64], index: 5, kind: input, shape index: {}]   ;;  %s7003_s6 = inlined_call_operand.vmem [shape: f32[1,64], index: 6, kind: input, shape index: {}]   ;;  %s7004_s7 = inlined_call_operand.vmem [shape: bf16[64,2], index: 7, kind: input, shape index: {}]   ;;  %s7005_s8 = inlined_call_operand.vmem [shape: f32[1,2], index: 8, kind: input, shape index: {}]   ;;  %s7006_s9 = inlined_call_operand.hbm [shape: f32[2,1,2], index: 9, kind: output, shape index: {}]  }
   0x1   :  { %16 = vsyncpa [#allocation4 + $0x1], 0  ;;  %s5565_s30 = smov 0   ;;  %s5567_s10 = smov 0  }
   0x2   :  { %s5569_s11 = smov 0   ;;  %s5571_s12 = smov 0  }
   0x3 LB: > { %s5586_s13 = sadd.s32 4294967295, %s5509_s12   ;;  %s4067_s14 = sadd.s32 4294967294, %s5509_s12   ;;  %s5509_s12 = sphi %s5571_s12, %s7059_s12   ;;  %s5505_s11 = sphi %s5569_s11, %s7058_s11   ;;  %s5501_s10 = sphi %s5567_s10, %s7057_s10   ;;  %s5497_s30 = sphi %s5565_s30, %s7056_s30  }
   0x4   : > { %s5590_s15 = sadd.s32 1, %s5509_s12   ;;  %s223_s16 = sadd.s32 1, %s5505_s11 }
   0x5   : > { %s220_s17 = ssub.s32 %s5509_s12, %s5590_s15  ;;  %p233_p0 = scmp.ne.s32.totalorder %s5505_s11, %s5501_s10 }
   0x6   : > { %p221_p1 = scmp.eq.s32.totalorder %s220_s17, 0  ;;  %p234_p2 = scmp.eq.s32.totalorder %s5586_s13, 1 }
   0x7   : > { %p239_p3 = scmp.ne.s32.totalorder %s5501_s10, %s5497_s30  ;;  %p240_p4 = scmp.eq.s32.totalorder %s4067_s14, 1 }
   0x8   : > { %s5601_s18 = scalar_select %p221_p1, %s5505_s11, %s223_s16  }
   0x9   : > { %p5603_p5 = por %p234_p2, %p233_p0  ;;  %p5607_p6 = por %p240_p4, %p239_p3 }
   0xa   : > { %p4070_p7 = scmp.ge.s32.totalorder %s5509_s12, 1  ;;  %p290_p8 = scmp.lt.s32.totalorder %s5509_s12, 3 }
   0xc   : > { %p291_p9 = pnand %p4070_p7, %p290_p8 }
   0xe   : > { %294 = sbr.rel (%p291_p9) target bundleno = 1860 (0x744), region = 56 }
  0x15   : > { %vm594_vm0 = vcmask 1040384   ;;  %vm595_vm1 = vcmask 1041408   ;;  %v4101_v0 = vld [vmem:[%s6998_s1 + $0x4] sm:$0x3]  ;;  %p325_p10 = scmp.lt.s32.totalorder %s5586_s13, 1  ;;  %v5511_v1 = vmov 65535  }
  0x16   : > { %v596_v2 = vsel %vm594_vm0, 4294967295, %v5511_v1  ;;  %v4116_v3 = vld [vmem:[%s6998_s1 + $0x6] sm:$0x3]  ;;  %v4131_v7 = vld [vmem:[%s6998_s1 + $0x8] sm:$0x3]  ;;  %vm936_vm2 = vcmask 1045504  }
  0x17   : > { %v5620_v4 = vsel %vm595_vm1, %v596_v2, 0  ;;  %s326_s25 = scalar_select %p325_p10, %s5586_s13, 1  ;;  %vm551_vm3 = vcmask 23552   ;;  %vm436_vm4 = vcmask 1046528   ;;  %vm2458_vm5 = vcmask 523264  }
  0x18   : > { %7028 = vst [vmem:[#allocation6_spill] sm:$0xff] %v5620_v4  ;;  %v1094_v5 = vand.u32 %v4101_v0, %v5620_v4  ;;  %v1276_v6 = vand.u32 %v4116_v3, %v5620_v4  ;;  %v5689_v34 = vand.u32 %v4131_v7, %v5620_v4  ;;  %vm5513_vm6 = vmmov 0   ;;  %s4384_s21 = sshll.u32 %s5586_s13, 4  ;;  %s5514_s13 = smov [#allocation3]  }
  0x19   : > { %s5344_s26 = smul.u32 384, %s326_s25  ;;  %vm2515_vm7 = vcmask 516096   ;;  %vm2523_vm8 = vcmask 518146   ;;  %vm2531_vm9 = vcmask 520196   ;;  %vm2539_vm10 = vcmask 522246   ;;  %s5451_s14 = sshll.u32 %s5514_s13, 4  ;;  %s5452_s14 = int_to_ptr.vmem [resolvable:$false] %s5451_s14 }
  0x1a   : > { %4670 = vmatprep.subr.bf16.mxu0 %v1094_v5  ;;  %7032 = vst [vmem:[#allocation10_spill] sm:$0xff] %v5689_v34  ;;  %vm3986_vm11 = vcmask 8192   ;;  %s5453_s16 = scalar_lea.vmem %s5452_s14, 32 }
  0x1b   : > { %4671 = vmatpush3.bf16.msra.mxu0 %v1094_v5  ;;  %s5628_s29 = scalar_lea.vmem %s6997_s0, %s5344_s26  ;;  %s6954_s26 = scalar_lea.hbm %s7006_s9, %s4384_s21 }
  0x1c   : > { %v5634_v8 = vld [vmem:[%s5628_s29] sm:$0xff]  ;;  %v5637_v9 = vld [vmem:[%s5628_s29 + $0x8] sm:$0xff]  ;;  %v5640_v10 = vld [vmem:[%s5628_s29 + $0x10] sm:$0xff]  ;;  %4700 = vmatprep.subr.bf16.mxu0 %v1276_v6 }
  0x1d   : > { %7029 = vst [vmem:[#allocation7_spill] sm:$0xff] %v5634_v8  ;;  %7030 = vst [vmem:[#allocation8_spill] sm:$0xff] %v5637_v9  ;;  %v937_v11 = vrot.slane %v5634_v8, 2  ;;  %v938_v12 = vrot.slane %v5637_v9, 2  ;;  %v940_v13 = vrot.slane %v5640_v10, 2  ;;  %v5646_v14 = vld [vmem:[%s5628_s29 + $0x18] sm:$0xff] }
  0x1e   : > { %7031 = vst [vmem:[#allocation9_spill] sm:$0xff] %v5640_v10  ;;  %v5649_v15 = vld [vmem:[%s5628_s29 + $0x20] sm:$0xff]  ;;  %v5652_v16 = vld [vmem:[%s5628_s29 + $0x28] sm:$0xff]  ;;  %v942_v17 = vrot.slane %v5646_v14, 2  ;;  %v5658_v20 = vld [vmem:[%s5628_s29 + $0x30] sm:$0xff] }
  0x1f   : > { %v943_v18 = vrot.slane %v5649_v15, 2  ;;  %v945_v19 = vrot.slane %v5652_v16, 2  ;;  %v5661_v21 = vld [vmem:[%s5628_s29 + $0x38] sm:$0xff]  ;;  %v5664_v22 = vld [vmem:[%s5628_s29 + $0x40] sm:$0xff]  ;;  %v939_v23 = vsel %vm936_vm2, %v937_v11, %v938_v12  ;;  %v941_v24 = vsel %vm936_vm2, %v938_v12, %v940_v13  ;;  %v5669_v25 = vld [vmem:[%s5628_s29 + $0x48] sm:$0xff] }
  0x20   : > { %v5672_v26 = vld [vmem:[%s5628_s29 + $0x50] sm:$0xff]  ;;  %v5675_v27 = vld [vmem:[%s5628_s29 + $0x58] sm:$0xff]  ;;  %v1035_v28 = vpack.c.bf16 %v941_v24, %v939_v23  ;;  %v5680_v31 = vld [vmem:[%s5628_s29 + $0x60] sm:$0xff]  ;;  %v947_v36 = vrot.slane %v5658_v20, 2  ;;  %v948_v37 = vrot.slane %v5661_v21, 2  ;;  %v950_v38 = vrot.slane %v5664_v22, 2 }
  0x21   : > { %v944_v29 = vsel %vm936_vm2, %v942_v17, %v943_v18  ;;  %v946_v30 = vsel %vm936_vm2, %v943_v18, %v945_v19  ;;  %v5683_v32 = vld [vmem:[%s5628_s29 + $0x68] sm:$0xff]  ;;  %v5686_v33 = vld [vmem:[%s5628_s29 + $0x70] sm:$0xff]  ;;  %v952_v39 = vrot.slane %v5669_v25, 2  ;;  %v953_v40 = vrot.slane %v5672_v26, 2  ;;  %v5708_v47 = vld [vmem:[%s5628_s29 + $0x78] sm:$0xff] }
  0x22   : > { %v5691_v35 = vpack.c.bf16 %v946_v30, %v944_v29  ;;  %4672 = vmatprep.mubr.msk.bf16.mxu0 %vm551_vm3, %v1035_v28  ;;  %v955_v41 = vrot.slane %v5675_v27, 2  ;;  %v957_v42 = vrot.slane %v5680_v31, 2  ;;  %v949_v43 = vsel %vm936_vm2, %v947_v36, %v948_v37  ;;  %v5711_v48 = vld [vmem:[%s5628_s29 + $0x80] sm:$0xff]  ;;  %v5714_v49 = vld [vmem:[%s5628_s29 + $0x88] sm:$0xff]  ;;  %v5721_v53 = vld [vmem:[%s5628_s29 + $0x90] sm:$0xff] }
  0x23   : > { %v951_v44 = vsel %vm936_vm2, %v948_v37, %v950_v38  ;;  %v958_v45 = vrot.slane %v5683_v32, 2  ;;  %v960_v46 = vrot.slane %v5686_v33, 2  ;;  %v954_v51 = vsel %vm936_vm2, %v952_v39, %v953_v40  ;;  %v5724_v54 = vld [vmem:[%s5628_s29 + $0x98] sm:$0xff]  ;;  %v5727_v55 = vld [vmem:[%s5628_s29 + $0xa0] sm:$0xff]  ;;  %v5739_v61 = vld [vmem:[%s5628_s29 + $0xa8] sm:$0xff] }
  0x24   : > { %7033 = vst [vmem:[#allocation11_spill] sm:$0xff] %v5691_v35  ;;  %4673 = vmatmul.mubr.msk.bf16.vlgmr.msra.gmra.mrb[0].mxu0 %vm551_vm3, %v5691_v35  ;;  %v5716_v50 = vpack.c.bf16 %v951_v44, %v949_v43  ;;  %v956_v52 = vsel %vm936_vm2, %v953_v40, %v955_v41  ;;  %v962_v59 = vrot.slane %v5708_v47, 2  ;;  %v963_v60 = vrot.slane %v5711_v48, 2  ;;  %v5746_v2 = vld [vmem:[%s5628_s29 + $0xb0] sm:$0xff]  ;;  %v5749_v3 = vld [vmem:[%s5628_s29 + $0xb8] sm:$0xff]  ;;  %v5757_v7 = vld [vmem:[%s5628_s29 + $0xc8] sm:$0xff] }
  0x25   : > { %4701 = vmatpush3.bf16.msra.mxu0 %v1276_v6  ;;  %v959_v56 = vsel %vm936_vm2, %v957_v42, %v958_v45  ;;  %v961_v57 = vsel %vm936_vm2, %v958_v45, %v960_v46  ;;  %v5734_v58 = vpack.c.bf16 %v956_v52, %v954_v51  ;;  %v965_v62 = vrot.slane %v5714_v49, 2  ;;  %v5754_v6 = vld [vmem:[%s5628_s29 + $0xc0] sm:$0xff]  ;;  %v5760_v11 = vld [vmem:[%s5628_s29 + $0xd0] sm:$0xff]  ;;  %v5765_v17 = vld [vmem:[%s5628_s29 + $0xd8] sm:$0xff] }
  0x26   : > { %7034 = vst [vmem:[#allocation12_spill] sm:$0xff] %v5716_v50  ;;  %4730 = vmatprep.subr.bf16.mxu0 %v5689_v34  ;;  %4676 = vmatprep.mubr.msk.bf16.mxu0 %vm551_vm3, %v5716_v50  ;;  %v967_v63 = vrot.slane %v5721_v53, 2  ;;  %v968_v0 = vrot.slane %v5724_v54, 2  ;;  %v970_v1 = vrot.slane %v5727_v55, 2  ;;  %v5751_v5 = vpack.c.bf16 %v961_v57, %v959_v56  ;;  %v5768_v18 = vld [vmem:[%s5628_s29 + $0xe0] sm:$0xff]  ;;  %v5771_v19 = vld [vmem:[%s5628_s29 + $0xe8] sm:$0xff] }
  0x27   : > { %7035 = vst [vmem:[#allocation13_spill] sm:$0xff] %v5734_v58  ;;  %v964_v24 = vsel %vm936_vm2, %v962_v59, %v963_v60  ;;  %v972_v28 = vrot.slane %v5739_v61, 2  ;;  %v973_v29 = vrot.slane %v5746_v2, 2  ;;  %v5778_v30 = vld [vmem:[%s5628_s29 + $0xf0] sm:$0xff]  ;;  %v5781_v36 = vld [vmem:[%s5628_s29 + $0xf8] sm:$0xff]  ;;  %v5784_v37 = vld [vmem:[%s5628_s29 + $0x100] sm:$0xff]  ;;  %v966_v39 = vsel %vm936_vm2, %v963_v60, %v965_v62 }
  0x28   : > { %7036 = vst [vmem:[#allocation14_spill] sm:$0xff] %v5751_v5  ;;  %v5787_v38 = vld [vmem:[%s5628_s29 + $0x108] sm:$0xff]  ;;  %v969_v40 = vsel %vm936_vm2, %v967_v63, %v968_v0  ;;  %v971_v41 = vsel %vm936_vm2, %v968_v0, %v970_v1  ;;  %v975_v42 = vrot.slane %v5749_v3, 2  ;;  %v5796_v43 = vld [vmem:[%s5628_s29 + $0x110] sm:$0xff]  ;;  %v5799_v44 = vld [vmem:[%s5628_s29 + $0x118] sm:$0xff]  ;;  %v977_v51 = vrot.slane %v5754_v6, 2 }
  0x29   : > { %v5802_v45 = vld [vmem:[%s5628_s29 + $0x120] sm:$0xff]  ;;  %v5805_v46 = vld [vmem:[%s5628_s29 + $0x128] sm:$0xff]  ;;  %v978_v52 = vrot.slane %v5757_v7, 2  ;;  %v5812_v56 = vld [vmem:[%s5628_s29 + $0x130] sm:$0xff]  ;;  %v980_v59 = vrot.slane %v5760_v11, 2  ;;  %v982_v60 = vrot.slane %v5765_v17, 2  ;;  %v5819_v62 = vpack.c.bf16 %v966_v39, %v964_v24 }
  0x2a   : > { %7037 = vst [vmem:[#allocation15_spill] sm:$0xff] %v5802_v45  ;;  %7038 = vst [vmem:[#allocation16_spill] sm:$0xff] %v5805_v46  ;;  %v5815_v57 = vld [vmem:[%s5628_s29 + $0x138] sm:$0xff]  ;;  %v5821_v63 = vpack.c.bf16 %v971_v41, %v969_v40  ;;  %v983_v0 = vrot.slane %v5768_v18, 2  ;;  %v985_v1 = vrot.slane %v5771_v19, 2  ;;  %v987_v23 = vrot.slane %v5778_v30, 2 }
  0x2b   : > { %v988_v12 = vrot.slane %v5781_v36, 2  ;;  %v990_v13 = vrot.slane %v5784_v37, 2  ;;  %v995_v24 = vrot.slane %v5799_v44, 2  ;;  %v997_v39 = vrot.slane %v5802_v45, 2  ;;  %v5837_v10 = vld [vmem:[%s5628_s29 + $0x140] sm:$0xff]  ;;  %v5840_v9 = vld [vmem:[%s5628_s29 + $0x148] sm:$0xff] }
  0x2c   : > { %4677 = vmatmul.mubr.msk.bf16.gmra.mrb[4].mxu0 %vm551_vm3, %v5734_v58  ;;  %v993_v58 = vrot.slane %v5796_v43, 2  ;;  %v998_v40 = vrot.slane %v5805_v46, 2  ;;  %v974_v41 = vsel %vm936_vm2, %v972_v28, %v973_v29  ;;  %v976_v50 = vsel %vm936_vm2, %v973_v29, %v975_v42 }
  0x2d   : > { %4680 = vmatprep.mubr.msk.bf16.mxu0 %vm551_vm3, %v5751_v5  ;;  %v992_v5 = vrot.slane %v5787_v38, 2  ;;  %v1000_v35 = vrot.slane %v5812_v56, 2  ;;  %v979_v34 = vsel %vm936_vm2, %v977_v51, %v978_v52  ;;  %v981_v4 = vsel %vm936_vm2, %v978_v52, %v980_v59 }
  0x2e   : > { %v984_v45 = vsel %vm936_vm2, %v982_v60, %v983_v0  ;;  %v986_v46 = vsel %vm936_vm2, %v983_v0, %v985_v1  ;;  %v989_v28 = vsel %vm936_vm2, %v987_v23, %v988_v12  ;;  %v991_v29 = vsel %vm936_vm2, %v988_v12, %v990_v13 }
  0x2f   : > { %v994_v42 = vsel %vm936_vm2, %v992_v5, %v993_v58  ;;  %v996_v51 = vsel %vm936_vm2, %v993_v58, %v995_v24  ;;  %v5855_v8 = vpack.c.bf16 %v976_v50, %v974_v41  ;;  %v5857_v52 = vpack.c.bf16 %v981_v4, %v979_v34 }
  0x30   : > { %v5859_v59 = vpack.c.bf16 %v986_v46, %v984_v45  ;;  %v5861_v60 = vpack.c.bf16 %v991_v29, %v989_v28  ;;  %v5864_v0 = vsel %vm936_vm2, %v997_v39, %v998_v40  ;;  %v1003_v12 = vrot.slane %v5837_v10, 2 }
  0x31   : > { %v5868_v23 = vpack.c.bf16 %v996_v51, %v994_v42  ;;  %v5871_v5 = vsel %vm936_vm2, %v998_v40, %v1000_v35  ;;  %v442_v50 = vrot.slane %v5646_v14, 1  ;;  %v443_v4 = vrot.slane %v5649_v15, 1 }
  0x32   : > { %v445_v34 = vrot.slane %v5652_v16, 1  ;;  %v7039_v58 = vrot.slane %v5661_v21, 1  ;;  %v7040_v45 = vrot.slane %v5658_v20, 1  ;;  %v7041_v1 = vrot.slane %v5664_v22, 1 }
  0x33   : > { %v452_v35 = vrot.slane %v5669_v25, 1  ;;  %v444_v40 = vsel %vm436_vm4, %v442_v50, %v443_v4  ;;  %v453_v16 = vrot.slane %v5672_v26, 1  ;;  %v455_v28 = vrot.slane %v5675_v27, 1 }
  0x34   : > { %4681 = vmatmul.mubr.msk.bf16.gmra.mrb[8].mxu0 %vm551_vm3, %v5819_v62  ;;  %v449_v46 = vsel %vm436_vm4, %v7040_v45, %v7039_v58  ;;  %v7042_v24 = vmov %v7039_v58  ;;  %v446_v29 = vsel %vm436_vm4, %v443_v4, %v445_v34  ;;  %v457_v42 = vrot.slane %v5680_v31, 1 }
  0x35   : > { %4684 = vmatprep.mubr.msk.bf16.mxu0 %vm551_vm3, %v5821_v63  ;;  %v451_v39 = vsel %vm436_vm4, %v7042_v24, %v7041_v1  ;;  %v458_v22 = vrot.slane %v5683_v32, 1  ;;  %v460_v51 = vrot.slane %v5686_v33, 1  ;;  %v5898_v58 = vpack.c.bf16 %v446_v29, %v444_v40 }
  0x36   : > { %v5888_v41 = vpack.c.bf16 %v451_v39, %v449_v46  ;;  %v454_v50 = vsel %vm436_vm4, %v452_v35, %v453_v16  ;;  %v456_v45 = vsel %vm436_vm4, %v453_v16, %v455_v28  ;;  %v462_v46 = vrot.slane %v5708_v47, 1 }
  0x37   : > { %v5905_v27 = vpack.c.bf16 %v456_v45, %v454_v50  ;;  %v459_v4 = vsel %vm436_vm4, %v457_v42, %v458_v22  ;;  %v461_v33 = vsel %vm436_vm4, %v458_v22, %v460_v51  ;;  %v463_v34 = vrot.slane %v5711_v48, 1 }
  0x38   : > { %v5910_v1 = vpack.c.bf16 %v461_v33, %v459_v4  ;;  %v465_v24 = vrot.slane %v5714_v49, 1  ;;  %v467_v39 = vrot.slane %v5721_v53, 1  ;;  %v468_v35 = vrot.slane %v5724_v54, 1 }
  0x39   : > { %v464_v40 = vsel %vm436_vm4, %v462_v46, %v463_v34  ;;  %v470_v16 = vrot.slane %v5727_v55, 1  ;;  %v472_v28 = vrot.slane %v5739_v61, 1  ;;  %v473_v29 = vrot.slane %v5746_v2, 1 }
  0x3a   : > { %v466_v42 = vsel %vm436_vm4, %v463_v34, %v465_v24  ;;  %v469_v22 = vsel %vm436_vm4, %v467_v39, %v468_v35  ;;  %v475_v51 = vrot.slane %v5749_v3, 1  ;;  %v477_v49 = vrot.slane %v5754_v6, 1 }
  0x3b   : > { %v5923_v50 = vpack.c.bf16 %v466_v42, %v464_v40  ;;  %v471_v45 = vsel %vm436_vm4, %v468_v35, %v470_v16  ;;  %v474_v46 = vsel %vm436_vm4, %v472_v28, %v473_v29  ;;  %v478_v55 = vrot.slane %v5757_v7, 1 }
  0x3c   : > { %4685 = vmatmul.mubr.msk.bf16.gmra.mrb[12].mxu0 %vm551_vm3, %v5855_v8  ;;  %v5928_v4 = vpack.c.bf16 %v471_v45, %v469_v22  ;;  %v476_v33 = vsel %vm436_vm4, %v473_v29, %v475_v51  ;;  %v480_v34 = vrot.slane %v5760_v11, 1  ;;  %v482_v24 = vrot.slane %v5765_v17, 1 }
  0x3d   : > { %4688 = vmatprep.mubr.msk.bf16.mxu0 %vm551_vm3, %v5857_v52  ;;  %v5933_v39 = vpack.c.bf16 %v476_v33, %v474_v46  ;;  %v479_v3 = vsel %vm436_vm4, %v477_v49, %v478_v55  ;;  %v483_v40 = vrot.slane %v5768_v18, 1  ;;  %v485_v35 = vrot.slane %v5771_v19, 1 }
  0x3e   : > { %v481_v16 = vsel %vm436_vm4, %v478_v55, %v480_v34  ;;  %v487_v28 = vrot.slane %v5778_v30, 1  ;;  %v488_v29 = vrot.slane %v5781_v36, 1  ;;  %v490_v11 = vrot.slane %v5784_v37, 1  ;;  %v7043_v34 = vld [vmem:[#allocation15_spill] sm:$0xff] }
  0x3f   : > { %v5946_v42 = vpack.c.bf16 %v481_v16, %v479_v3  ;;  %v484_v22 = vsel %vm436_vm4, %v482_v24, %v483_v40  ;;  %v486_v19 = vsel %vm436_vm4, %v483_v40, %v485_v35  ;;  %v492_v51 = vrot.slane %v5787_v38, 1  ;;  %v7044_v16 = vld [vmem:[#allocation16_spill] sm:$0xff] }
  0x40   : > { %v5951_v49 = vpack.c.bf16 %v486_v19, %v484_v22  ;;  %v489_v45 = vsel %vm436_vm4, %v487_v28, %v488_v29  ;;  %v491_v46 = vsel %vm436_vm4, %v488_v29, %v490_v11  ;;  %v493_v55 = vrot.slane %v5796_v43, 1 }
  0x41   : > { %v5956_v37 = vpack.c.bf16 %v491_v46, %v489_v45  ;;  %v495_v33 = vrot.slane %v5799_v44, 1  ;;  %v497_v3 = vrot.slane %v7043_v34, 1  ;;  %v498_v24 = vrot.slane %v7044_v16, 1 }
  0x42   : > { %v494_v40 = vsel %vm436_vm4, %v492_v51, %v493_v55  ;;  %v500_v35 = vrot.slane %v5812_v56, 1  ;;  %v502_v22 = vrot.slane %v5815_v57, 1  ;;  %v503_v28 = vrot.slane %v5837_v10, 1 }
  0x43   : > { %v5967_v29 = vpack.c.bf16 %v5871_v5, %v5864_v0  ;;  %v496_v11 = vsel %vm436_vm4, %v493_v55, %v495_v33  ;;  %v499_v44 = vsel %vm436_vm4, %v497_v3, %v498_v24  ;;  %v505_v19 = vrot.slane %v5840_v9, 1 }
  0x44   : > { %4689 = vmatmul.mubr.msk.bf16.gmra.mrb[16].mxu0 %vm551_vm3, %v5859_v59  ;;  %v5972_v45 = vpack.c.bf16 %v496_v11, %v494_v40  ;;  %v501_v51 = vsel %vm436_vm4, %v498_v24, %v500_v35  ;;  %v504_v56 = vsel %vm436_vm4, %v502_v22, %v503_v28  ;;  %v7045_v5 = vrot.slane %v5815_v57, 2  ;;  %v7048_v35 = vld [vmem:[#allocation10_spill] sm:$0xff] }
  0x45   : > { %4692 = vmatprep.mubr.msk.bf16.mxu0 %vm551_vm3, %v5861_v60  ;;  %v5976_v46 = vpack.c.bf16 %v501_v51, %v499_v44  ;;  %v506_v13 = vsel %vm436_vm4, %v503_v28, %v505_v19  ;;  %v7046_v33 = vrot.slane %v5840_v9, 2  ;;  %v4146_v9 = vld [vmem:[%s6998_s1 + $0xa] sm:$0x3]  ;;  %v6010_v40 = vpack.c.bf16 %v5661_v21, %v5658_v20  ;;  %v4072_v28 = vld [vmem:[%s6998_s1 + $0x2] sm:$0x3]  ;;  %v7049_v44 = vld [vmem:[#allocation7_spill] sm:$0xff] }
  0x46   : > { %v5981_v0 = vpack.c.bf16 %v506_v13, %v504_v56  ;;  %v1004_v55 = vsel %vm936_vm2, %v7045_v5, %v1003_v12  ;;  %v5999_v13 = vpack.c.bf16 %v5649_v15, %v5646_v14  ;;  %v7047_v14 = vld [vmem:[#allocation6_spill] sm:$0xff]  ;;  %v6024_v20 = vpack.c.bf16 %v5683_v32, %v5680_v31  ;;  %v7050_v51 = vld [vmem:[#allocation8_spill] sm:$0xff]  ;;  %v7051_v5 = vld [vmem:[#allocation9_spill] sm:$0xff] }
  0x47   : > { %v1006_v3 = vsel %vm936_vm2, %v1003_v12, %v7046_v33  ;;  %v6014_v12 = vpack.c.bf16 %v5672_v26, %v5669_v25  ;;  %v1657_v15 = vand.u32 %v4146_v9, %v7047_v14  ;;  %v6028_v21 = vpack.c.bf16 %v5711_v48, %v5708_v47  ;;  %v6051_v32 = vld [vmem:[%s5628_s29 + $0x150] sm:$0xff]  ;;  %v6054_v47 = vld [vmem:[%s5628_s29 + $0x158] sm:$0xff] }
  0x48   : > { %v5995_v24 = vpack.c.bf16 %v1006_v3, %v1004_v55  ;;  %v6036_v25 = vpack.c.bf16 %v5724_v54, %v5721_v53  ;;  %v6040_v26 = vpack.c.bf16 %v5746_v2, %v5739_v61  ;;  %v6048_v31 = vpack.c.bf16 %v5757_v7, %v5754_v6  ;;  %v6065_v61 = vld [vmem:[%s5628_s29 + $0x160] sm:$0xff] }
  0x49   : > { %v6058_v48 = vpack.c.bf16 %v5768_v18, %v5765_v17  ;;  %v1643_v53 = vrot.slane %v6051_v32, 2  ;;  %v1644_v54 = vrot.slane %v6054_v47, 2  ;;  %v1646_v6 = vrot.slane %v6065_v61, 2 }
  0x4a   : > { %v6074_v17 = vpack.c.bf16 %v5781_v36, %v5778_v30  ;;  %v6080_v22 = vpack.c.bf16 %v5796_v43, %v5787_v38  ;;  %v599_v11 = vand.u32 %v4072_v28, %v7047_v14  ;;  %v437_v19 = vrot.slane %v7049_v44, 1  ;;  %v4191_v28 = vld [vmem:[%s6998_s1 + $0x10] sm:$0x3] }
  0x4b   : > { %v1645_v2 = vsel %vm936_vm2, %v1643_v53, %v1644_v54  ;;  %v1647_v7 = vsel %vm936_vm2, %v1644_v54, %v1646_v6  ;;  %v438_v56 = vrot.slane %v7050_v51, 1  ;;  %v440_v55 = vrot.slane %v7051_v5, 1  ;;  %v7054_v6 = vld [vmem:[#allocation13_spill] sm:$0xff] }
  0x4c   : > { %4693 = vmatmul.mubr.msk.bf16.gmra.mrb[20].mxu0 %vm551_vm3, %v5868_v23  ;;  %v6076_v18 = vpack.c.bf16 %v1647_v7, %v1645_v2  ;;  %4610 = vmatprep.subr.bf16.mxu1 %v599_v11  ;;  %v6097_v43 = vpack.c.bf16 %v7044_v16, %v7043_v34  ;;  %v6102_v33 = vpack.c.bf16 %v5837_v10, %v5815_v57  ;;  %v4161_v10 = vld [vmem:[%s6998_s1 + $0xc] sm:$0x3]  ;;  %v1454_v9 = vrot.slane %v6051_v32, 1  ;;  %v7053_v2 = vld [vmem:[#allocation12_spill] sm:$0xff]  ;;  %v7055_v7 = vld [vmem:[#allocation14_spill] sm:$0xff] }
  0x4d   : > { %4696 = vmatprep.mubr.msk.bf16.mxu0 %vm551_vm3, %v5967_v29  ;;  %v439_v30 = vsel %vm436_vm4, %v437_v19, %v438_v56  ;;  %v441_v36 = vsel %vm436_vm4, %v438_v56, %v440_v55  ;;  %4611 = vmatpush3.bf16.msra.mxu1 %v599_v11  ;;  %v6114_v34 = vpack.c.bf16 %v6054_v47, %v6051_v32 }
  0x4e   : > { %v535_v38 = vpack.c.bf16 %v441_v36, %v439_v30  ;;  %v1839_v57 = vand.u32 %v4161_v10, %v7047_v14  ;;  %v379_v3 = vpack.c.bf16 %v7050_v51, %v7049_v44  ;;  %v2220_v11 = vand.u32 %v4191_v28, %v7047_v14 }
  0x50   : > { %4612 = vmatprep.mubr.msk.bf16.mxu1 %vm551_vm3, %v535_v38 }
  0x51   : > { %4613 = vmatmul.mubr.msk.bf16.vlgmr.msra.gmra.mrb[0].mxu1 %vm551_vm3, %v5898_v58 }
  0x52   : > { %4616 = vmatprep.mubr.msk.bf16.mxu1 %vm551_vm3, %v5888_v41 }
  0x54   : > { %4697 = vmatmul.mubr.msk.bf16.gmra.mrb[24].mxu0 %vm551_vm3, %v5995_v24 }
  0x55   : > { %4702 = vmatprep.mubr.msk.bf16.mxu0 %vm551_vm3, %v5999_v13 }
  0x59   : > { %4617 = vmatmul.mubr.msk.bf16.gmra.mrb[4].mxu1 %vm551_vm3, %v5905_v27 }
  0x5a   : > { %4620 = vmatprep.mubr.msk.bf16.mxu1 %vm551_vm3, %v5910_v1 }
  0x5c   : > { %4703 = vmatmul.mubr.msk.bf16.vlgmr.msra.gmra.mrb[0].mxu0 %vm551_vm3, %v6010_v40 }
  0x5d   : > { %4731 = vmatpush3.bf16.msra.mxu0 %v7048_v35  ;;  %4706 = vmatprep.mubr.msk.bf16.mxu0 %vm551_vm3, %v6014_v12  ;;  %v1457_v35 = vrot.slane %v6065_v61, 1 }
  0x5e   : > { %4760 = vmatprep.subr.bf16.mxu0 %v1657_v15 }
  0x61   : > { %4621 = vmatmul.mubr.msk.bf16.gmra.mrb[8].mxu1 %vm551_vm3, %v5923_v50 }
  0x62   : > { %4624 = vmatprep.mubr.msk.bf16.mxu1 %vm551_vm3, %v5928_v4 }
  0x64   : > { %4707 = vmatmul.mubr.msk.bf16.gmra.mrb[4].mxu0 %vm551_vm3, %v6024_v20 }
  0x65   : > { %4710 = vmatprep.mubr.msk.bf16.mxu0 %vm551_vm3, %v6028_v21 }
  0x69   : > { %4625 = vmatmul.mubr.msk.bf16.gmra.mrb[12].mxu1 %vm551_vm3, %v5933_v39 }
  0x6a   : > { %4628 = vmatprep.mubr.msk.bf16.mxu1 %vm551_vm3, %v5946_v42 }
  0x6c   : > { %4711 = vmatmul.mubr.msk.bf16.gmra.mrb[8].mxu0 %vm551_vm3, %v6036_v25 }
  0x6d   : > { %4714 = vmatprep.mubr.msk.bf16.mxu0 %vm551_vm3, %v6040_v26 }
  0x71   : > { %4629 = vmatmul.mubr.msk.bf16.gmra.mrb[16].mxu1 %vm551_vm3, %v5951_v49 }
  0x72   : > { %4632 = vmatprep.mubr.msk.bf16.mxu1 %vm551_vm3, %v5956_v37 }
  0x74   : > { %4715 = vmatmul.mubr.msk.bf16.gmra.mrb[12].mxu0 %vm551_vm3, %v6048_v31 }
  0x75   : > { %4718 = vmatprep.mubr.msk.bf16.mxu0 %vm551_vm3, %v6058_v48 }
  0x79   : > { %4633 = vmatmul.mubr.msk.bf16.gmra.mrb[20].mxu1 %vm551_vm3, %v5972_v45 }
  0x7a   : > { %4636 = vmatprep.mubr.msk.bf16.mxu1 %vm551_vm3, %v5976_v46 }
  0x7c   : > { %4719 = vmatmul.mubr.msk.bf16.gmra.mrb[16].mxu0 %vm551_vm3, %v6074_v17 }
  0x7d   : > { %4722 = vmatprep.mubr.msk.bf16.mxu0 %vm551_vm3, %v6080_v22 }
  0x81   : > { %4637 = vmatmul.mubr.msk.bf16.gmra.mrb[24].mxu1 %vm551_vm3, %v5981_v0 }
  0x82   : > { %4642 = vmatprep.mubr.msk.bf16.mxu1 %vm551_vm3, %v379_v3 }
  0x84   : > { %4723 = vmatmul.mubr.msk.bf16.gmra.mrb[20].mxu0 %vm551_vm3, %v6097_v43 }
  0x85   : > { %4726 = vmatprep.mubr.msk.bf16.mxu0 %vm551_vm3, %v6102_v33 }
  0x8c   : > { %4727 = vmatmul.mubr.msk.bf16.gmra.mrb[24].mxu0 %vm551_vm3, %v6114_v34 }
  0x8d   : > { %4732 = vmatprep.mubr.msk.bf16.mxu0 %vm551_vm3, %v5898_v58  ;;  %v393_v58 = vld [vmem:[%s6998_s1] sm:$0x3] }
  0x8e   : > { %v789_v16 = vand.u32 %v7047_v14, %v393_v58  ;;  %v5389_v58 = vld [vmem:[%s7000_s3 + $0x30] sm:$0xff]  }
  0x90   : > { %4640 = vmatprep.subr.bf16.mxu1 %v789_v16 }
  0x91   : > { %4641 = vmatpush3.bf16.msra.mxu1 %v789_v16  ;;  %v5390_v16 = vld [vmem:[%s7000_s3 + $0x38] sm:$0xff]  }
  0x94   : > { %4733 = vmatmul.mubr.msk.bf16.vlgmr.msra.gmra.mrb[0].mxu0 %vm551_vm3, %v5888_v41  ;;  %4643 = vmatmul.mubr.msk.bf16.vlgmr.msra.gmra.mrb[0].mxu1 %vm551_vm3, %v5999_v13  ;;  %v7052_v13 = vld [vmem:[#allocation11_spill] sm:$0xff] }
  0x95   : > { %4761 = vmatpush3.bf16.msra.mxu0 %v1657_v15  ;;  %4736 = vmatprep.mubr.msk.bf16.mxu0 %vm551_vm3, %v5905_v27  ;;  %v1455_v15 = vrot.slane %v6054_v47, 1  ;;  %v4176_v47 = vld [vmem:[%s6998_s1 + $0xe] sm:$0x3] }
  0x96   : > { %4790 = vmatprep.subr.bf16.mxu0 %v1839_v57  ;;  %4646 = vmatprep.mubr.msk.bf16.mxu1 %vm551_vm3, %v6010_v40  ;;  %v2031_v61 = vand.u32 %v4176_v47, %v7047_v14  ;;  %v377_v14 = vld [vmem:[%s5628_s29 + $0x170] sm:$0xff] }
  0x97   : > { %v1456_v53 = vsel %vm436_vm4, %v1454_v9, %v1455_v15  ;;  %v1458_v32 = vsel %vm436_vm4, %v1455_v15, %v1457_v35  ;;  %v2207_v44 = vrot.slane %v377_v14, 2  ;;  %v6438_v9 = vld [vmem:[%s6999_s2] ss:$0 sm:$0xff] }
  0x98   : > { %v6186_v54 = vpack.c.bf16 %v1458_v32, %v1456_v53 }
  0x9c   : > { %4737 = vmatmul.mubr.msk.bf16.gmra.mrb[4].mxu0 %vm551_vm3, %v5910_v1  ;;  %4647 = vmatmul.mubr.msk.bf16.gmra.mrb[4].mxu1 %vm551_vm3, %v6014_v12 }
  0x9d   : > { %4740 = vmatprep.mubr.msk.bf16.mxu0 %vm551_vm3, %v5923_v50  ;;  %4650 = vmatprep.mubr.msk.bf16.mxu1 %vm551_vm3, %v6024_v20 }
  0xa4   : > { %4741 = vmatmul.mubr.msk.bf16.gmra.mrb[8].mxu0 %vm551_vm3, %v5928_v4  ;;  %4651 = vmatmul.mubr.msk.bf16.gmra.mrb[8].mxu1 %vm551_vm3, %v6028_v21 }
  0xa5   : > { %4744 = vmatprep.mubr.msk.bf16.mxu0 %vm551_vm3, %v5933_v39  ;;  %4654 = vmatprep.mubr.msk.bf16.mxu1 %vm551_vm3, %v6036_v25 }
  0xac   : > { %4745 = vmatmul.mubr.msk.bf16.gmra.mrb[12].mxu0 %vm551_vm3, %v5946_v42  ;;  %4655 = vmatmul.mubr.msk.bf16.gmra.mrb[12].mxu1 %vm551_vm3, %v6040_v26 }
  0xad   : > { %4748 = vmatprep.mubr.msk.bf16.mxu0 %vm551_vm3, %v5951_v49  ;;  %4658 = vmatprep.mubr.msk.bf16.mxu1 %vm551_vm3, %v6048_v31 }
  0xb4   : > { %4749 = vmatmul.mubr.msk.bf16.gmra.mrb[16].mxu0 %vm551_vm3, %v5956_v37  ;;  %4659 = vmatmul.mubr.msk.bf16.gmra.mrb[16].mxu1 %vm551_vm3, %v6058_v48 }
  0xb5   : > { %4752 = vmatprep.mubr.msk.bf16.mxu0 %vm551_vm3, %v5972_v45  ;;  %4662 = vmatprep.mubr.msk.bf16.mxu1 %vm551_vm3, %v6074_v17 }
  0xbc   : > { %4753 = vmatmul.mubr.msk.bf16.gmra.mrb[20].mxu0 %vm551_vm3, %v5976_v46  ;;  %4663 = vmatmul.mubr.msk.bf16.gmra.mrb[20].mxu1 %vm551_vm3, %v6080_v22 }
  0xbd   : > { %4756 = vmatprep.mubr.msk.bf16.mxu0 %vm551_vm3, %v5981_v0  ;;  %4666 = vmatprep.mubr.msk.bf16.mxu1 %vm551_vm3, %v6097_v43 }
  0xc4   : > { %4757 = vmatmul.mubr.msk.bf16.gmra.mrb[24].mxu0 %vm551_vm3, %v6186_v54  ;;  %4667 = vmatmul.mubr.msk.bf16.gmra.mrb[24].mxu1 %vm551_vm3, %v6102_v33 }
  0xc5   : > { %4762 = vmatprep.mubr.msk.bf16.mxu0 %vm551_vm3, %v7052_v13 }
  0xcc   : > { %4763 = vmatmul.mubr.msk.bf16.vlgmr.msra.gmra.mrb[0].mxu0 %vm551_vm3, %v7053_v2 }
  0xcd   : > { %4791 = vmatpush3.bf16.msra.mxu0 %v1839_v57  ;;  %4766 = vmatprep.mubr.msk.bf16.mxu0 %vm551_vm3, %v7054_v6  ;;  %v5388_v57 = vld [vmem:[%s7000_s3 + $0x28] sm:$0xff]  }
  0xce   : > { %4820 = vmatprep.subr.bf16.mxu0 %v2031_v61 }
  0xd4   : > { %4767 = vmatmul.mubr.msk.bf16.gmra.mrb[4].mxu0 %vm551_vm3, %v7055_v7 }
  0xd5   : > { %4770 = vmatprep.mubr.msk.bf16.mxu0 %vm551_vm3, %v5819_v62 }
  0xdc   : > { %4771 = vmatmul.mubr.msk.bf16.gmra.mrb[8].mxu0 %vm551_vm3, %v5821_v63 }
  0xdd   : > { %4774 = vmatprep.mubr.msk.bf16.mxu0 %vm551_vm3, %v5855_v8 }
  0xe4   : > { %4775 = vmatmul.mubr.msk.bf16.gmra.mrb[12].mxu0 %vm551_vm3, %v5857_v52 }
  0xe5   : > { %4778 = vmatprep.mubr.msk.bf16.mxu0 %vm551_vm3, %v5859_v59 }
  0xec   : > { %4779 = vmatmul.mubr.msk.bf16.gmra.mrb[16].mxu0 %vm551_vm3, %v5861_v60 }
  0xed   : > { %4782 = vmatprep.mubr.msk.bf16.mxu0 %vm551_vm3, %v5868_v23 }
  0xf4   : > { %4783 = vmatmul.mubr.msk.bf16.gmra.mrb[20].mxu0 %vm551_vm3, %v5967_v29 }
  0xf5   : > { %4786 = vmatprep.mubr.msk.bf16.mxu0 %vm551_vm3, %v5995_v24 }
  0xfc   : > { %4787 = vmatmul.mubr.msk.bf16.gmra.mrb[24].mxu0 %vm551_vm3, %v6076_v18 }
  0xfd   : > { %4792 = vmatprep.mubr.msk.bf16.mxu0 %vm551_vm3, %v6010_v40  ;;  %v376_v40 = vld [vmem:[%s5628_s29 + $0x168] sm:$0xff] }
 0x104   : > { %4793 = vmatmul.mubr.msk.bf16.vlgmr.msra.gmra.mrb[0].mxu0 %vm551_vm3, %v6014_v12  ;;  %v2206_v12 = vrot.slane %v376_v40, 2 }
 0x105   : > { %4821 = vmatpush3.bf16.msra.mxu0 %v2031_v61  ;;  %4796 = vmatprep.mubr.msk.bf16.mxu0 %vm551_vm3, %v6024_v20  ;;  %v378_v20 = vld [vmem:[%s5628_s29 + $0x178] sm:$0xff]  ;;  %s323_s29 = sand.u32 1, %s5501_s10  }
 0x106   : > { %4850 = vmatprep.subr.bf16.mxu0 %v2220_v11  ;;  %s324_s22 = scalar_lea.vmem [#allocation3], %s323_s29  ;;  %s4000_s27 = scalar_lea.sflag [#allocation4], %s323_s29 }
 0x107   : > { %s4012_s23 = sshll.u32 %s324_s22, 4  ;;  %s6956_s23 = int_to_ptr.vmem [resolvable:$true] %s4012_s23 }
 0x108   : > { %s5447_s28 = scalar_lea.vmem %s6956_s23, 16  ;;  %p5454_p0 = scmp.lt.s32.totalorder %s6956_s23, %s5452_s14 }
 0x109   : > { %p5448_p11 = scmp.ne.s32.totalorder %s6956_s23, %s5447_s28  ;;  %p5455_p1 = scmp.lt.s32.totalorder %s5453_s16, %s5447_s28 }
 0x10b   : > { %p5449_p12 = pnand %p5448_p11, %p5603_p5  ;;  %p5456_p2 = por %p5455_p1, %p5454_p0 }
 0x10c   : > { %4797 = vmatmul.mubr.msk.bf16.gmra.mrb[4].mxu0 %vm551_vm3, %v6028_v21  ;;  %v2208_v21 = vsel %vm936_vm2, %v2206_v12, %v2207_v44 }
 0x10d   : > { %4800 = vmatprep.mubr.msk.bf16.mxu0 %vm551_vm3, %v6036_v25  ;;  %v2209_v25 = vrot.slane %v378_v20, 2  ;;  %p5450_p13 = pneg %p5449_p12 }
 0x10f   : > { %v2210_v19 = vsel %vm936_vm2, %v2207_v44, %v2209_v25  ;;  %p5457_p3 = pnand %p5456_p2, %p5450_p13 }
 0x114   : > { %4801 = vmatmul.mubr.msk.bf16.gmra.mrb[8].mxu0 %vm551_vm3, %v6040_v26  ;;  %v2213_v26 = vpack.c.bf16 %v2210_v19, %v2208_v21 }
 0x115   : > { %4804 = vmatprep.mubr.msk.bf16.mxu0 %vm551_vm3, %v6048_v31  ;;  %v1832_v31 = vpack.c.bf16 %v377_v14, %v376_v40 }
 0x11c   : > { %4805 = vmatmul.mubr.msk.bf16.gmra.mrb[12].mxu0 %vm551_vm3, %v6058_v48  ;;  %v5387_v48 = vld [vmem:[%s7000_s3 + $0x20] sm:$0xff]  }
 0x11d   : > { %4808 = vmatprep.mubr.msk.bf16.mxu0 %vm551_vm3, %v6074_v17  ;;  %v5512_v17 = vmov 0.0  }
 0x11e   : > { %4880 = vmatprep.subr.bf16.mxu1 %v5512_v17  ;;  %2459 = vst.msk [vmem:[#allocation2] sm:$0xff] %vm2458_vm5, %v5512_v17  ;;  %2460 = vst.msk [vmem:[#allocation2 + $0x8] sm:$0xff] %vm2458_vm5, %v5512_v17  ;;  %4888 = vmatprep.mubr.msk.bf16.mxu1 %vm5513_vm6, %v5512_v17 }
 0x11f   : > { %4881 = vmatpush3.bf16.msra.mxu1 %v5387_v48  ;;  %2461 = vst.msk [vmem:[#allocation2 + $0x10] sm:$0xff] %vm2458_vm5, %v5512_v17  ;;  %2462 = vst.msk [vmem:[#allocation2 + $0x18] sm:$0xff] %vm2458_vm5, %v5512_v17 }
 0x120   : > { %4882 = vmatprep.subr.bf16.mxu1 %v5512_v17  ;;  %2463 = vst.msk [vmem:[#allocation2 + $0x20] sm:$0xff] %vm2458_vm5, %v5512_v17  ;;  %2464 = vst.msk [vmem:[#allocation2 + $0x28] sm:$0xff] %vm2458_vm5, %v5512_v17 }
 0x121   : > { %2465 = vst.msk [vmem:[#allocation2 + $0x30] sm:$0xff] %vm2458_vm5, %v5512_v17  ;;  %2466 = vst.msk [vmem:[#allocation2 + $0x38] sm:$0xff] %vm2458_vm5, %v5512_v17 }
 0x122   : > { %2467 = vst.msk [vmem:[#allocation2 + $0x40] sm:$0xff] %vm2458_vm5, %v5512_v17  ;;  %2468 = vst.msk [vmem:[#allocation2 + $0x48] sm:$0xff] %vm2458_vm5, %v5512_v17 }
 0x123   : > { %4883 = vmatpush3.bf16.msra.mxu1 %v5388_v57  ;;  %2469 = vst.msk [vmem:[#allocation2 + $0x50] sm:$0xff] %vm2458_vm5, %v5512_v17  ;;  %2470 = vst.msk [vmem:[#allocation2 + $0x58] sm:$0xff] %vm2458_vm5, %v5512_v17 }
 0x124   : > { %4809 = vmatmul.mubr.msk.bf16.gmra.mrb[16].mxu0 %vm551_vm3, %v6080_v22  ;;  %2471 = vst.msk [vmem:[#allocation2 + $0x60] sm:$0xff] %vm2458_vm5, %v5512_v17  ;;  %2472 = vst.msk [vmem:[#allocation2 + $0x68] sm:$0xff] %vm2458_vm5, %v5512_v17  ;;  %4884 = vmatprep.subr.bf16.mxu1 %v5512_v17 }
 0x125   : > { %4812 = vmatprep.mubr.msk.bf16.mxu0 %vm551_vm3, %v6097_v43 }
 0x127   : > { %4885 = vmatpush3.bf16.msra.mxu1 %v5389_v58 }
 0x128   : > { %4886 = vmatprep.subr.bf16.mxu1 %v5512_v17 }
 0x12b   : > { %4887 = vmatpush3.bf16.msra.mxu1 %v5390_v16 }
 0x12c   : > { %4813 = vmatmul.mubr.msk.bf16.gmra.mrb[20].mxu0 %vm551_vm3, %v6102_v33  ;;  %4900 = vmatprep.subr.bf16.mxu1 %v5512_v17 }
 0x12d   : > { %4816 = vmatprep.mubr.msk.bf16.mxu0 %vm551_vm3, %v6114_v34 }
 0x134   : > { %4817 = vmatmul.mubr.msk.bf16.gmra.mrb[24].mxu0 %vm551_vm3, %v1832_v31 }
 0x135   : > { %4822 = vmatprep.mubr.msk.bf16.mxu0 %vm551_vm3, %v5888_v41  ;;  %v2017_v41 = vrot.slane %v376_v40, 1 }
 0x13c   : > { %4823 = vmatmul.mubr.msk.bf16.vlgmr.msra.gmra.mrb[0].mxu0 %vm551_vm3, %v5905_v27  ;;  %v2018_v27 = vrot.slane %v377_v14, 1 }
 0x13d   : > { %4851 = vmatpush3.bf16.msra.mxu0 %v2220_v11  ;;  %4826 = vmatprep.mubr.msk.bf16.mxu0 %vm551_vm3, %v5910_v1  ;;  %v2020_v1 = vrot.slane %v378_v20, 1 }
 0x144   : > { %4827 = vmatmul.mubr.msk.bf16.gmra.mrb[4].mxu0 %vm551_vm3, %v5923_v50  ;;  %v2019_v50 = vsel %vm436_vm4, %v2017_v41, %v2018_v27 }
 0x145   : > { %4830 = vmatprep.mubr.msk.bf16.mxu0 %vm551_vm3, %v5928_v4  ;;  %v2021_v4 = vsel %vm436_vm4, %v2018_v27, %v2020_v1 }
 0x14c   : > { %4831 = vmatmul.mubr.msk.bf16.gmra.mrb[8].mxu0 %vm551_vm3, %v5933_v39  ;;  %v2024_v39 = vpack.c.bf16 %v2021_v4, %v2019_v50 }
 0x14d   : > { %4834 = vmatprep.mubr.msk.bf16.mxu0 %vm551_vm3, %v5946_v42 }
 0x154   : > { %4835 = vmatmul.mubr.msk.bf16.gmra.mrb[12].mxu0 %vm551_vm3, %v5951_v49 }
 0x155   : > { %4838 = vmatprep.mubr.msk.bf16.mxu0 %vm551_vm3, %v5956_v37 }
 0x15c   : > { %4839 = vmatmul.mubr.msk.bf16.gmra.mrb[16].mxu0 %vm551_vm3, %v5972_v45 }
 0x15d   : > { %4842 = vmatprep.mubr.msk.bf16.mxu0 %vm551_vm3, %v5976_v46 }
 0x164   : > { %4843 = vmatmul.mubr.msk.bf16.gmra.mrb[20].mxu0 %vm551_vm3, %v5981_v0 }
 0x165   : > { %4846 = vmatprep.mubr.msk.bf16.mxu0 %vm551_vm3, %v6186_v54 }
 0x167   : > { %v4644_v42 = vpop.f32.mrb[0].mxu1 }
 0x168   : > { %v825_v49 = vpop.f32.mrb[1].mxu1 }
 0x169   : > { %v6332_v37 = vpop.f32.mrb[2].mxu1 }
 0x16c   : > { %4847 = vmatmul.mubr.msk.bf16.gmra.mrb[24].mxu0 %vm551_vm3, %v2024_v39 }
 0x16d   : > { %4852 = vmatprep.mubr.msk.bf16.mxu0 %vm551_vm3, %v7053_v2 }
 0x174   : > { %4853 = vmatmul.mubr.msk.bf16.vlgmr.msra.gmra.mrb[0].mxu0 %vm551_vm3, %v7054_v6 }
 0x175   : > { %4856 = vmatprep.mubr.msk.bf16.mxu0 %vm551_vm3, %v7055_v7 }
 0x17c   : > { %4857 = vmatmul.mubr.msk.bf16.gmra.mrb[4].mxu0 %vm551_vm3, %v5819_v62  ;;  %v6334_v62 = vpop.f32.mrb[3].mxu1 }
 0x17d   : > { %4860 = vmatprep.mubr.msk.bf16.mxu0 %vm551_vm3, %v5821_v63  ;;  %v6338_v63 = vpop.f32.mrb[4].mxu1 }
 0x184   : > { %4861 = vmatmul.mubr.msk.bf16.gmra.mrb[8].mxu0 %vm551_vm3, %v5855_v8  ;;  %v6342_v8 = vpop.f32.mrb[5].mxu1 }
 0x185   : > { %4864 = vmatprep.mubr.msk.bf16.mxu0 %vm551_vm3, %v5857_v52  ;;  %v6344_v52 = vpop.f32.mrb[6].mxu1 }
 0x18c   : > { %4865 = vmatmul.mubr.msk.bf16.gmra.mrb[12].mxu0 %vm551_vm3, %v5859_v59  ;;  %v6346_v59 = vpop.f32.mrb[7].mxu1 }
 0x18d   : > { %4868 = vmatprep.mubr.msk.bf16.mxu0 %vm551_vm3, %v5861_v60  ;;  %v6350_v60 = vpop.f32.mrb[8].mxu1 }
 0x194   : > { %4869 = vmatmul.mubr.msk.bf16.gmra.mrb[16].mxu0 %vm551_vm3, %v5868_v23  ;;  %v6354_v23 = vpop.f32.mrb[9].mxu1 }
 0x195   : > { %4872 = vmatprep.mubr.msk.bf16.mxu0 %vm551_vm3, %v5967_v29  ;;  %v6356_v45 = vpop.f32.mrb[10].mxu1 }
 0x196   : > { %v6358_v46 = vpop.f32.mrb[11].mxu1 }
 0x197   : > { %v6361_v29 = vpop.f32.mrb[12].mxu1 }
 0x198   : > { %v6363_v0 = vpop.f32.mrb[13].mxu1 }
 0x199   : > { %v6365_v22 = vpop.f32.mrb[14].mxu1 }
 0x19c   : > { %4873 = vmatmul.mubr.msk.bf16.gmra.mrb[20].mxu0 %vm551_vm3, %v5995_v24  ;;  %v6367_v24 = vpop.f32.mrb[15].mxu1 }
 0x19d   : > { %4876 = vmatprep.mubr.msk.bf16.mxu0 %vm551_vm3, %v6076_v18  ;;  %v6369_v51 = vpop.f32.mrb[16].mxu1 }
 0x19e   : > { %v6371_v56 = vpop.f32.mrb[17].mxu1 }
 0x19f   : > { %v6373_v18 = vpop.f32.mrb[18].mxu1 }
 0x1a0   : > { %v6375_v5 = vpop.f32.mrb[19].mxu1 }
 0x1a1   : > { %v6377_v55 = vpop.f32.mrb[20].mxu1 }
 0x1a2   : > { %v6379_v30 = vpop.f32.mrb[21].mxu1 }
 0x1a3   : > { %v6381_v36 = vpop.f32.mrb[22].mxu1 }
 0x1a4   : > { %4877 = vmatmul.mubr.msk.bf16.gmra.mrb[24].mxu0 %vm551_vm3, %v2213_v26  ;;  %v6383_v38 = vpop.f32.mrb[23].mxu1 }
 0x1a5   : > { %v6385_v43 = vpop.f32.mrb[24].mxu1 }
 0x1a6   : > { %v6387_v33 = vpop.f32.mrb[25].mxu1 }
 0x1a7   : > { %v6389_v34 = vpop.f32.mrb[26].mxu1 }
 0x1a8   : > { %v6391_v10 = vpop.f32.mrb[27].mxu1 }
 0x247   : > { %v4854_v3 = vpop.f32.mrb[0].mxu0 }
 0x248   : > { %v5120_v15 = vadd.f32 %v4854_v3, %v4644_v42  ;;  %v2256_v35 = vpop.f32.mrb[1].mxu0 }
 0x249   : > { %v5121_v53 = vadd.f32 %v2256_v35, %v825_v49  ;;  %v4855_v32 = vpop.f32.mrb[2].mxu0 }
 0x24a   : > { %v2404_v54 = vadd.f32 %v5120_v15, %v6438_v9  ;;  %v5122_v13 = vadd.f32 %v4855_v32, %v6332_v37  ;;  %v2259_v47 = vpop.f32.mrb[3].mxu0 }
 0x24b   : > { %v2402_v61 = vadd.f32 %v5121_v53, %v6438_v9  ;;  %v5123_v2 = vadd.f32 %v2259_v47, %v6334_v62 }
 0x24c   : > { %v2432_v6 = vmax.f32 %v2404_v54, 0.0  ;;  %v2405_v7 = vadd.f32 %v5122_v13, %v6438_v9 }
 0x24d   : > { %v2430_v28 = vmax.f32 %v2402_v61, 0.0  ;;  %v2403_v11 = vadd.f32 %v5123_v2, %v6438_v9 }
 0x24e   : > { %v2433_v40 = vmax.f32 %v2405_v7, 0.0 }
 0x24f   : > { %v2473_v14 = vmax.f32 %v2430_v28, %v2432_v6  ;;  %v2431_v12 = vmax.f32 %v2403_v11, 0.0  ;;  %v4858_v44 = vpop.f32.mrb[4].mxu0 }
 0x250   : > { %v5124_v20 = vadd.f32 %v4858_v44, %v6338_v63  ;;  %v2272_v21 = vpop.f32.mrb[5].mxu0 }
 0x251   : > { %v2494_v25 = vrot.slane %v2473_v14, 1  ;;  %v2474_v19 = vmax.f32 %v2431_v12, %v2433_v40  ;;  %v5125_v26 = vadd.f32 %v2272_v21, %v6342_v8  ;;  %v4859_v31 = vpop.f32.mrb[6].mxu0 }
 0x252   : > { %v2408_v48 = vadd.f32 %v5124_v20, %v6438_v9  ;;  %v5126_v41 = vadd.f32 %v4859_v31, %v6344_v52  ;;  %v2275_v27 = vpop.f32.mrb[7].mxu0 }
 0x253   : > { %v2508_v1 = vmax.f32 %v2473_v14, %v2494_v25  ;;  %v2554_v50 = vrot.slane %v2474_v19, 1  ;;  %v2406_v4 = vadd.f32 %v5125_v26, %v6438_v9  ;;  %v5127_v39 = vadd.f32 %v2275_v27, %v6346_v59 }
 0x254   : > { %v2436_v42 = vmax.f32 %v2408_v48, 0.0  ;;  %v2409_v49 = vadd.f32 %v5126_v41, %v6438_v9 }
 0x255   : > { %2516 = vst.msk [vmem:[#allocation2] sm:$0x1] %vm2515_vm7, %v2508_v1  ;;  %v2568_v37 = vmax.f32 %v2474_v19, %v2554_v50  ;;  %v2434_v62 = vmax.f32 %v2406_v4, 0.0  ;;  %v2407_v63 = vadd.f32 %v5127_v39, %v6438_v9 }
 0x256   : > { %2524 = vst.msk [vmem:[#allocation2 - $0x1] sm:$0x4] %vm2523_vm8, %v2508_v1  ;;  %v2437_v8 = vmax.f32 %v2409_v49, 0.0 }
 0x257   : > { %2532 = vst.msk [vmem:[#allocation2 - $0x2] sm:$0x10] %vm2531_vm9, %v2508_v1  ;;  %2589 = vst.msk [vmem:[#allocation2 + $0x2] sm:$0x10] %vm2531_vm9, %v2568_v37  ;;  %v2475_v52 = vmax.f32 %v2434_v62, %v2436_v42  ;;  %v2435_v59 = vmax.f32 %v2407_v63, 0.0  ;;  %v4862_v57 = vpop.f32.mrb[8].mxu0 }
 0x258   : > { %2540 = vst.msk [vmem:[#allocation2 - $0x3] sm:$0x40] %vm2539_vm10, %v2508_v1  ;;  %v5128_v58 = vadd.f32 %v4862_v57, %v6350_v60  ;;  %v2288_v16 = vpop.f32.mrb[9].mxu0 }
 0x259   : > { %2575 = vst.msk [vmem:[#allocation2 + $0x4] sm:$0x1] %vm2515_vm7, %v2568_v37  ;;  %v2495_v3 = vrot.slane %v2475_v52, 1  ;;  %v2476_v15 = vmax.f32 %v2435_v59, %v2437_v8  ;;  %v5129_v35 = vadd.f32 %v2288_v16, %v6354_v23  ;;  %v4863_v53 = vpop.f32.mrb[10].mxu0 }
 0x25a   : > { %2582 = vst.msk [vmem:[#allocation2 + $0x3] sm:$0x4] %vm2523_vm8, %v2568_v37  ;;  %v2412_v32 = vadd.f32 %v5128_v58, %v6438_v9  ;;  %v5130_v54 = vadd.f32 %v4863_v53, %v6356_v45  ;;  %v2291_v13 = vpop.f32.mrb[11].mxu0 }
 0x25b   : > { %v2509_v47 = vmax.f32 %v2475_v52, %v2495_v3  ;;  %v2555_v61 = vrot.slane %v2476_v15, 1  ;;  %v2410_v2 = vadd.f32 %v5129_v35, %v6438_v9  ;;  %v5131_v6 = vadd.f32 %v2291_v13, %v6358_v46 }
 0x25c   : > { %v2440_v7 = vmax.f32 %v2412_v32, 0.0  ;;  %v2413_v60 = vadd.f32 %v5130_v54, %v6438_v9  ;;  %v5392_v54 = vld [vmem:[%s7000_s3 + $0x8] sm:$0xff]  }
 0x25d   : > { %2517 = vst.msk [vmem:[#allocation2 + $0x10] sm:$0x1] %vm2515_vm7, %v2509_v47  ;;  %v2569_v23 = vmax.f32 %v2476_v15, %v2555_v61  ;;  %v2438_v45 = vmax.f32 %v2410_v2, 0.0  ;;  %v2411_v28 = vadd.f32 %v5131_v6, %v6438_v9 }
 0x25e   : > { %2525 = vst.msk [vmem:[#allocation2 + $0xf] sm:$0x4] %vm2523_vm8, %v2509_v47  ;;  %v2441_v11 = vmax.f32 %v2413_v60, 0.0 }
 0x25f   : > { %2533 = vst.msk [vmem:[#allocation2 + $0xe] sm:$0x10] %vm2531_vm9, %v2509_v47  ;;  %2590 = vst.msk [vmem:[#allocation2 + $0x12] sm:$0x10] %vm2531_vm9, %v2569_v23  ;;  %v2477_v46 = vmax.f32 %v2438_v45, %v2440_v7  ;;  %v2439_v40 = vmax.f32 %v2411_v28, 0.0  ;;  %v4866_v14 = vpop.f32.mrb[12].mxu0 }
 0x260   : > { %2541 = vst.msk [vmem:[#allocation2 + $0xd] sm:$0x40] %vm2539_vm10, %v2509_v47  ;;  %v5132_v12 = vadd.f32 %v4866_v14, %v6361_v29  ;;  %v2304_v44 = vpop.f32.mrb[13].mxu0 }
 0x261   : > { %2576 = vst.msk [vmem:[#allocation2 + $0x14] sm:$0x1] %vm2515_vm7, %v2569_v23  ;;  %v2496_v20 = vrot.slane %v2477_v46, 1  ;;  %v2478_v21 = vmax.f32 %v2439_v40, %v2441_v11  ;;  %v5133_v25 = vadd.f32 %v2304_v44, %v6363_v0  ;;  %v4867_v19 = vpop.f32.mrb[14].mxu0  ;;  %v2612_v49 = vld [vmem:[#allocation2 + $0x1] sm:$0xff] }
 0x262   : > { %2583 = vst.msk [vmem:[#allocation2 + $0x13] sm:$0x4] %vm2523_vm8, %v2569_v23  ;;  %v2416_v26 = vadd.f32 %v5132_v12, %v6438_v9  ;;  %v5134_v31 = vadd.f32 %v4867_v19, %v6365_v22  ;;  %v2307_v48 = vpop.f32.mrb[15].mxu0  ;;  %v5393_v23 = vld [vmem:[%s7000_s3 + $0x10] sm:$0xff]  }
 0x263   : > { %v2510_v41 = vmax.f32 %v2477_v46, %v2496_v20  ;;  %v2556_v27 = vrot.slane %v2478_v21, 1  ;;  %v2414_v1 = vadd.f32 %v5133_v25, %v6438_v9  ;;  %v5135_v50 = vadd.f32 %v2307_v48, %v6367_v24  ;;  %v5391_v24 = vld [vmem:[%s7000_s3] sm:$0xff]  }
 0x264   : > { %v2444_v4 = vmax.f32 %v2416_v26, 0.0  ;;  %v2417_v29 = vadd.f32 %v5134_v31, %v6438_v9 }
 0x265   : > { %2518 = vst.msk [vmem:[#allocation2 + $0x20] sm:$0x1] %vm2515_vm7, %v2510_v41  ;;  %v2570_v0 = vmax.f32 %v2478_v21, %v2556_v27  ;;  %v2442_v22 = vmax.f32 %v2414_v1, 0.0  ;;  %v2415_v39 = vadd.f32 %v5135_v50, %v6438_v9  ;;  %v5394_v27 = vld [vmem:[%s7000_s3 + $0x18] sm:$0xff]  }
 0x266   : > { %2526 = vst.msk [vmem:[#allocation2 + $0x1f] sm:$0x4] %vm2523_vm8, %v2510_v41  ;;  %v2445_v42 = vmax.f32 %v2417_v29, 0.0 }
 0x267   : > { %2534 = vst.msk [vmem:[#allocation2 + $0x1e] sm:$0x10] %vm2531_vm9, %v2510_v41  ;;  %2591 = vst.msk [vmem:[#allocation2 + $0x22] sm:$0x10] %vm2531_vm9, %v2570_v0  ;;  %v2479_v62 = vmax.f32 %v2442_v22, %v2444_v4  ;;  %v2443_v63 = vmax.f32 %v2415_v39, 0.0  ;;  %v4870_v8 = vpop.f32.mrb[16].mxu0 }
 0x268   : > { %2542 = vst.msk [vmem:[#allocation2 + $0x1d] sm:$0x40] %vm2539_vm10, %v2510_v41  ;;  %v5136_v59 = vadd.f32 %v4870_v8, %v6369_v51  ;;  %v2320_v57 = vpop.f32.mrb[17].mxu0 }
 0x269   : > { %v6488_v37 = vld [vmem:[#allocation2 + $0x11] sm:$0xff]  ;;  %2577 = vst.msk [vmem:[#allocation2 + $0x24] sm:$0x1] %vm2515_vm7, %v2570_v0  ;;  %v2497_v58 = vrot.slane %v2479_v62, 1  ;;  %v2480_v16 = vmax.f32 %v2443_v63, %v2445_v42  ;;  %v5137_v3 = vadd.f32 %v2320_v57, %v6371_v56  ;;  %v4871_v15 = vpop.f32.mrb[18].mxu0 }
 0x26a   : > { %2584 = vst.msk [vmem:[#allocation2 + $0x23] sm:$0x4] %vm2523_vm8, %v2570_v0  ;;  %v2617_v52 = vpack.c.bf16 %v6488_v37, %v2612_v49  ;;  %v2420_v35 = vadd.f32 %v5136_v59, %v6438_v9  ;;  %v5138_v53 = vadd.f32 %v4871_v15, %v6373_v18  ;;  %v2323_v32 = vpop.f32.mrb[19].mxu0  ;;  %v6527_v40 = vld [vmem:[#allocation2 + $0x12] sm:$0xff] }
 0x26b   : > { %v2511_v51 = vmax.f32 %v2479_v62, %v2497_v58  ;;  %v2557_v13 = vrot.slane %v2480_v16, 1  ;;  %v2418_v56 = vadd.f32 %v5137_v3, %v6438_v9  ;;  %v5139_v47 = vadd.f32 %v2323_v32, %v6375_v5 }
 0x26c   : > { %4889 = vmatmul.mubr.msk.bf16.vlgmr.msra.gmra.mrb[28].mxu1 %vm2458_vm5, %v2617_v52  ;;  %v2448_v61 = vmax.f32 %v2420_v35, 0.0  ;;  %v2421_v18 = vadd.f32 %v5138_v53, %v6438_v9 }
 0x26d   : > { %4901 = vmatpush3.bf16.msra.mxu1 %v5391_v24  ;;  %4892 = vmatprep.mubr.msk.bf16.mxu1 %vm5513_vm6, %v5512_v17  ;;  %2519 = vst.msk [vmem:[#allocation2 + $0x30] sm:$0x1] %vm2515_vm7, %v2511_v51  ;;  %v2571_v2 = vmax.f32 %v2480_v16, %v2557_v13  ;;  %v2446_v6 = vmax.f32 %v2418_v56, 0.0  ;;  %v2419_v7 = vadd.f32 %v5139_v47, %v6438_v9 }
 0x26e   : > { %4902 = vmatprep.subr.bf16.mxu1 %v5512_v17  ;;  %2527 = vst.msk [vmem:[#allocation2 + $0x2f] sm:$0x4] %vm2523_vm8, %v2511_v51  ;;  %v2449_v60 = vmax.f32 %v2421_v18, 0.0 }
 0x26f   : > { %2535 = vst.msk [vmem:[#allocation2 + $0x2e] sm:$0x10] %vm2531_vm9, %v2511_v51  ;;  %2592 = vst.msk [vmem:[#allocation2 + $0x32] sm:$0x10] %vm2531_vm9, %v2571_v2  ;;  %v2481_v28 = vmax.f32 %v2446_v6, %v2448_v61  ;;  %v2447_v11 = vmax.f32 %v2419_v7, 0.0  ;;  %v4874_v46 = vpop.f32.mrb[20].mxu0 }
 0x270   : > { %2543 = vst.msk [vmem:[#allocation2 + $0x2d] sm:$0x40] %vm2539_vm10, %v2511_v51  ;;  %v5140_v12 = vadd.f32 %v4874_v46, %v6377_v55  ;;  %v2336_v44 = vpop.f32.mrb[21].mxu0  ;;  %v6593_v46 = vld [vmem:[#allocation2 + $0x10] sm:$0xff] }
 0x271   : > { %4903 = vmatpush3.bf16.msra.mxu1 %v5392_v54  ;;  %v6516_v5 = vld [vmem:[#allocation2 + $0x21] sm:$0xff]  ;;  %2578 = vst.msk [vmem:[#allocation2 + $0x34] sm:$0x1] %vm2515_vm7, %v2571_v2  ;;  %v2498_v21 = vrot.slane %v2481_v28, 1  ;;  %v2482_v25 = vmax.f32 %v2447_v11, %v2449_v60  ;;  %v5141_v19 = vadd.f32 %v2336_v44, %v6379_v30  ;;  %v4875_v26 = vpop.f32.mrb[22].mxu0 }
 0x272   : > { %v6521_v45 = vld [vmem:[#allocation2 + $0x22] sm:$0xff]  ;;  %2585 = vst.msk [vmem:[#allocation2 + $0x33] sm:$0x4] %vm2523_vm8, %v2571_v2  ;;  %4904 = vmatprep.subr.bf16.mxu1 %v5512_v17  ;;  %v3029_v14 = vpack.c.bf16 %v6516_v5, %v6488_v37  ;;  %v2424_v31 = vadd.f32 %v5140_v12, %v6438_v9  ;;  %v5142_v48 = vadd.f32 %v4875_v26, %v6381_v36  ;;  %v2339_v41 = vpop.f32.mrb[23].mxu0  ;;  %v5410_v37 = vld [vmem:[%s7000_s3 + $0xb8] sm:$0xff]  }
 0x273   : > { %v3138_v20 = vpack.c.bf16 %v6521_v45, %v6527_v40  ;;  %v2512_v55 = vmax.f32 %v2481_v28, %v2498_v21  ;;  %v2558_v1 = vrot.slane %v2482_v25, 1  ;;  %v2422_v50 = vadd.f32 %v5141_v19, %v6438_v9  ;;  %v2596_v44 = vld [vmem:[#allocation2] sm:$0xff] }
 0x274   : > { %v5143_v4 = vadd.f32 %v2339_v41, %v6383_v38  ;;  %v2452_v30 = vmax.f32 %v2424_v31, 0.0  ;;  %v2425_v29 = vadd.f32 %v5142_v48, %v6438_v9  ;;  %v5395_v21 = vld [vmem:[%s7000_s3 + $0x40] sm:$0xff]   ;;  %v2601_v48 = vpack.c.bf16 %v6593_v46, %v2596_v44 }
 0x275   : > { %4905 = vmatpush3.bf16.msra.mxu1 %v5393_v23  ;;  %2520 = vst.msk [vmem:[#allocation2 + $0x40] sm:$0x1] %vm2515_vm7, %v2512_v55  ;;  %v2572_v36 = vmax.f32 %v2482_v25, %v2558_v1  ;;  %v2450_v0 = vmax.f32 %v2422_v50, 0.0  ;;  %v5396_v1 = vld [vmem:[%s7000_s3 + $0x48] sm:$0xff]  }
 0x276   : > { %4906 = vmatprep.subr.bf16.mxu1 %v5512_v17  ;;  %2528 = vst.msk [vmem:[#allocation2 + $0x3f] sm:$0x4] %vm2523_vm8, %v2512_v55  ;;  %v2423_v22 = vadd.f32 %v5143_v4, %v6438_v9  ;;  %v2453_v39 = vmax.f32 %v2425_v29, 0.0  ;;  %v2598_v4 = vld [vmem:[#allocation2 + $0x20] sm:$0xff] }
 0x277   : > { %2536 = vst.msk [vmem:[#allocation2 + $0x3e] sm:$0x10] %vm2531_vm9, %v2512_v55  ;;  %2593 = vst.msk [vmem:[#allocation2 + $0x42] sm:$0x10] %vm2531_vm9, %v2572_v36  ;;  %v2483_v38 = vmax.f32 %v2450_v0, %v2452_v30  ;;  %v4878_v24 = vpop.f32.mrb[24].mxu0  ;;  %v5397_v30 = vld [vmem:[%s7000_s3 + $0x50] sm:$0xff]  }
 0x278   : > { %2544 = vst.msk [vmem:[#allocation2 + $0x3d] sm:$0x40] %vm2539_vm10, %v2512_v55  ;;  %v2451_v49 = vmax.f32 %v2423_v22, 0.0  ;;  %v5144_v63 = vadd.f32 %v4878_v24, %v6385_v43  ;;  %v2352_v8 = vpop.f32.mrb[25].mxu0  ;;  %v2805_v22 = vld [vmem:[#allocation2 + $0x2] sm:$0xff]  ;;  %v5401_v24 = vld [vmem:[%s7000_s3 + $0x70] sm:$0xff]  }
 0x279   : > { %v6549_v42 = vld [vmem:[#allocation2 + $0x31] sm:$0xff]  ;;  %4907 = vmatpush3.bf16.msra.mxu1 %v5394_v27  ;;  %2579 = vst.msk [vmem:[#allocation2 + $0x44] sm:$0x1] %vm2515_vm7, %v2572_v36  ;;  %v2499_v52 = vrot.slane %v2483_v38, 1  ;;  %v5145_v57 = vadd.f32 %v2352_v8, %v6387_v33  ;;  %v4879_v58 = vpop.f32.mrb[26].mxu0 }
 0x27a   : > { %2586 = vst.msk [vmem:[#allocation2 + $0x43] sm:$0x4] %vm2523_vm8, %v2572_v36  ;;  %v6556_v62 = vpack.c.bf16 %v6549_v42, %v6516_v5  ;;  %4920 = vmatprep.subr.bf16.mxu1 %v5512_v17  ;;  %v2484_v59 = vmax.f32 %v2451_v49, %v2453_v39  ;;  %v2428_v16 = vadd.f32 %v5144_v63, %v6438_v9  ;;  %v2355_v15 = vpop.f32.mrb[27].mxu0  ;;  %v6584_v6 = vld [vmem:[#allocation2 + $0x32] sm:$0xff]  ;;  %v5399_v39 = vld [vmem:[%s7000_s3 + $0x60] sm:$0xff]   ;;  %v5400_v49 = vld [vmem:[%s7000_s3 + $0x68] sm:$0xff]  }
 0x27b   : > { %v5146_v3 = vadd.f32 %v4879_v58, %v6389_v34  ;;  %v2513_v35 = vmax.f32 %v2483_v38, %v2499_v52  ;;  %v2426_v43 = vadd.f32 %v5145_v57, %v6438_v9  ;;  %v5147_v32 = vadd.f32 %v2355_v15, %v6391_v10  ;;  %v2599_v50 = vld [vmem:[#allocation2 + $0x30] sm:$0xff]  ;;  %v5398_v36 = vld [vmem:[%s7000_s3 + $0x58] sm:$0xff]   ;;  %v5404_v58 = vld [vmem:[%s7000_s3 + $0x88] sm:$0xff]  }
 0x27c   : > { %4893 = vmatmul.mubr.msk.bf16.gmra.mrb[32].mxu1 %vm2458_vm5, %v6556_v62  ;;  %v2559_v53 = vrot.slane %v2484_v59, 1  ;;  %v2456_v54 = vmax.f32 %v2428_v16, 0.0  ;;  %v6630_v29 = vpack.c.bf16 %v2599_v50, %v2598_v4  ;;  %v2810_v38 = vpack.c.bf16 %v6527_v40, %v2805_v22  ;;  %v5402_v8 = vld [vmem:[%s7000_s3 + $0x78] sm:$0xff]   ;;  %v5405_v16 = vld [vmem:[%s7000_s3 + $0x90] sm:$0xff]  }
 0x27d   : > { %4896 = vmatprep.mubr.msk.bf16.mxu1 %vm5513_vm6, %v5512_v17  ;;  %v2429_v33 = vadd.f32 %v5146_v3, %v6438_v9  ;;  %2521 = vst.msk [vmem:[#allocation2 + $0x50] sm:$0x1] %vm2515_vm7, %v2513_v35  ;;  %v2454_v51 = vmax.f32 %v2426_v43, 0.0  ;;  %v2427_v13 = vadd.f32 %v5147_v32, %v6438_v9  ;;  %v6663_v63 = vpack.c.bf16 %v6584_v6, %v6521_v45  ;;  %v5406_v15 = vld [vmem:[%s7000_s3 + $0x98] sm:$0xff]   ;;  %v5408_v43 = vld [vmem:[%s7000_s3 + $0xa8] sm:$0xff]   ;;  %v5409_v32 = vld [vmem:[%s7000_s3 + $0xb0] sm:$0xff]  }
 0x27e   : > { %2529 = vst.msk [vmem:[#allocation2 + $0x4f] sm:$0x4] %vm2523_vm8, %v2513_v35  ;;  %v2573_v34 = vmax.f32 %v2484_v59, %v2559_v53  ;;  %v5403_v59 = vld [vmem:[%s7000_s3 + $0x80] sm:$0xff]   ;;  %v2920_v57 = vpack.c.bf16 %v2598_v4, %v6593_v46  ;;  %v5414_v45 = vld [vmem:[%s7000_s3 + $0xd8] sm:$0xff]  }
 0x27f   : > { %2537 = vst.msk [vmem:[#allocation2 + $0x4e] sm:$0x10] %vm2531_vm9, %v2513_v35  ;;  %v2457_v56 = vmax.f32 %v2429_v33, 0.0  ;;  %v2485_v10 = vmax.f32 %v2454_v51, %v2456_v54  ;;  %v2455_v18 = vmax.f32 %v2427_v13, 0.0  ;;  %v5407_v53 = vld [vmem:[%s7000_s3 + $0xa0] sm:$0xff]   ;;  %v5413_v54 = vld [vmem:[%s7000_s3 + $0xd0] sm:$0xff]  }
 0x280   : > { %2545 = vst.msk [vmem:[#allocation2 + $0x4d] sm:$0x40] %vm2539_vm10, %v2513_v35  ;;  %v5416_v33 = vld [vmem:[%s7000_s3 + $0xe8] sm:$0xff]   ;;  %v5418_v51 = vld [vmem:[%s7000_s3 + $0xf8] sm:$0xff]  }
 0x281   : > { %v6575_v47 = vld [vmem:[#allocation2 + $0x41] sm:$0xff]  ;;  %2580 = vst.msk [vmem:[#allocation2 + $0x54] sm:$0x1] %vm2515_vm7, %v2573_v34  ;;  %v2500_v60 = vrot.slane %v2485_v10, 1  ;;  %v2486_v23 = vmax.f32 %v2455_v18, %v2457_v56 }
 0x282   : > { %v6577_v61 = vld [vmem:[#allocation2 + $0x42] sm:$0xff]  ;;  %2587 = vst.msk [vmem:[#allocation2 + $0x53] sm:$0x4] %vm2523_vm8, %v2573_v34  ;;  %v2619_v2 = vpack.c.bf16 %v6575_v47, %v6575_v47  ;;  %v3030_v9 = vpack.c.bf16 %v6575_v47, %v6549_v42 }
 0x283   : > { %2594 = vst.msk [vmem:[#allocation2 + $0x52] sm:$0x10] %vm2531_vm9, %v2573_v34  ;;  %v3139_v7 = vpack.c.bf16 %v6577_v61, %v6584_v6  ;;  %v2514_v28 = vmax.f32 %v2485_v10, %v2500_v60  ;;  %v2560_v11 = vrot.slane %v2486_v23, 1  ;;  %v6602_v25 = vld [vmem:[#allocation2 + $0x40] sm:$0xff]  ;;  %v2812_v52 = vpack.c.bf16 %v6577_v61, %v6577_v61  ;;  %v5412_v42 = vld [vmem:[%s7000_s3 + $0xc8] sm:$0xff]   ;;  %v5417_v34 = vld [vmem:[%s7000_s3 + $0xf0] sm:$0xff]  }
 0x284   : > { %4897 = vmatmul.mubr.msk.bf16.gmra.mrb[36].mxu1 %vm2458_vm5, %v2619_v2  ;;  %v2603_v0 = vpack.c.bf16 %v6602_v25, %v6602_v25  ;;  %v2921_v3 = vpack.c.bf16 %v6602_v25, %v2599_v50  ;;  %v5419_v10 = vld [vmem:[%s7000_s3 + $0x100] sm:$0xff]   ;;  %v5420_v18 = vld [vmem:[%s7000_s3 + $0x108] sm:$0xff]   ;;  %v5421_v2 = vld [vmem:[%s7000_s3 + $0x110] sm:$0xff]  }
 0x285   : > { %4908 = vmatprep.mubr.msk.bf16.mxu1 %vm5513_vm6, %v5512_v17  ;;  %2522 = vst.msk [vmem:[#allocation2 + $0x60] sm:$0x1] %vm2515_vm7, %v2514_v28  ;;  %v2574_v12 = vmax.f32 %v2486_v23, %v2560_v11 }
 0x286   : > { %2530 = vst.msk [vmem:[#allocation2 + $0x5f] sm:$0x4] %vm2523_vm8, %v2514_v28 }
 0x287   : > { %2538 = vst.msk [vmem:[#allocation2 + $0x5e] sm:$0x10] %vm2531_vm9, %v2514_v28  ;;  %2595 = vst.msk [vmem:[#allocation2 + $0x62] sm:$0x10] %vm2531_vm9, %v2574_v12 }
 0x288   : > { %2546 = vst.msk [vmem:[#allocation2 + $0x5d] sm:$0x40] %vm2539_vm10, %v2514_v28 }
 0x289   : > { %2581 = vst.msk [vmem:[#allocation2 + $0x64] sm:$0x1] %vm2515_vm7, %v2574_v12 }
 0x28a   : > { %v6604_v19 = vld [vmem:[#allocation2 + $0x50] sm:$0xff]  ;;  %2588 = vst.msk [vmem:[#allocation2 + $0x63] sm:$0x4] %vm2523_vm8, %v2574_v12 }
 0x28b   : > { %v6606_v26 = vld [vmem:[#allocation2 + $0x51] sm:$0xff]  ;;  %v3249_v41 = vpack.c.bf16 %v6604_v19, %v6602_v25  ;;  %v2922_v35 = vpack.c.bf16 %v6604_v19, %v6604_v19 }
 0x28c   : > { %v6608_v31 = vld [vmem:[#allocation2 + $0x52] sm:$0xff]  ;;  %v3358_v27 = vpack.c.bf16 %v6606_v26, %v6575_v47  ;;  %4909 = vmatmul.mubr.msk.bf16.vlgmr.msra.gmra.mrb[40].mxu1 %vm2458_vm5, %v2601_v48  ;;  %v3031_v5 = vpack.c.bf16 %v6606_v26, %v6606_v26 }
 0x28d   : > { %v3467_v55 = vpack.c.bf16 %v6608_v31, %v6577_v61  ;;  %4921 = vmatpush3.bf16.msra.mxu1 %v5395_v21  ;;  %4912 = vmatprep.mubr.msk.bf16.mxu1 %vm5513_vm6, %v5512_v17  ;;  %v3140_v40 = vpack.c.bf16 %v6608_v31, %v6608_v31 }
 0x28e   : > { %4922 = vmatprep.subr.bf16.mxu1 %v5512_v17 }
 0x291   : > { %4923 = vmatpush3.bf16.msra.mxu1 %v5396_v1  ;;  %v3247_v13 = vld [vmem:[#allocation2 + $0x60] sm:$0xff] }
 0x292   : > { %4924 = vmatprep.subr.bf16.mxu1 %v5512_v17  ;;  %v3250_v56 = vpack.c.bf16 %v3247_v13, %v3247_v13  ;;  %v3356_v6 = vld [vmem:[#allocation2 + $0x61] sm:$0xff]  ;;  %v5426_v13 = vld [vmem:[%s7002_s5 + $0x38] sm:$0xff]  }
 0x294   : > { %4913 = vmatmul.mubr.msk.bf16.gmra.mrb[44].mxu1 %vm2458_vm5, %v6630_v29 }
 0x295   : > { %4925 = vmatpush3.bf16.msra.mxu1 %v5397_v30  ;;  %4916 = vmatprep.mubr.msk.bf16.mxu1 %vm5513_vm6, %v5512_v17 }
 0x296   : > { %4926 = vmatprep.subr.bf16.mxu1 %v5512_v17 }
 0x299   : > { %4927 = vmatpush3.bf16.msra.mxu1 %v5398_v36 }
 0x29a   : > { %4940 = vmatprep.subr.bf16.mxu1 %v5512_v17 }
 0x29c   : > { %4917 = vmatmul.mubr.msk.bf16.gmra.mrb[48].mxu1 %vm2458_vm5, %v2603_v0 }
 0x29d   : > { %4928 = vmatprep.mubr.msk.bf16.mxu1 %vm5513_vm6, %v5512_v17 }
 0x2a4   : > { %4929 = vmatmul.mubr.msk.bf16.vlgmr.msra.gmra.mrb[52].mxu1 %vm2458_vm5, %v2810_v38 }
 0x2a5   : > { %4941 = vmatpush3.bf16.msra.mxu1 %v5399_v39  ;;  %4932 = vmatprep.mubr.msk.bf16.mxu1 %vm5513_vm6, %v5512_v17 }
 0x2a6   : > { %4942 = vmatprep.subr.bf16.mxu1 %v5512_v17 }
 0x2a9   : > { %4943 = vmatpush3.bf16.msra.mxu1 %v5400_v49 }
 0x2aa   : > { %4944 = vmatprep.subr.bf16.mxu1 %v5512_v17 }
 0x2ac   : > { %4933 = vmatmul.mubr.msk.bf16.gmra.mrb[56].mxu1 %vm2458_vm5, %v6663_v63 }
 0x2ad   : > { %4945 = vmatpush3.bf16.msra.mxu1 %v5401_v24  ;;  %4936 = vmatprep.mubr.msk.bf16.mxu1 %vm5513_vm6, %v5512_v17 }
 0x2ae   : > { %4946 = vmatprep.subr.bf16.mxu1 %v5512_v17 }
 0x2b1   : > { %4947 = vmatpush3.bf16.msra.mxu1 %v5402_v8 }
 0x2b2   : > { %4960 = vmatprep.subr.bf16.mxu1 %v5512_v17 }
 0x2b4   : > { %4937 = vmatmul.mubr.msk.bf16.gmra.mrb[60].mxu1 %vm2458_vm5, %v2812_v52 }
 0x2b5   : > { %4948 = vmatprep.mubr.msk.bf16.mxu1 %vm5513_vm6, %v5512_v17 }
 0x2bc   : > { %4949 = vmatmul.mubr.msk.bf16.vlgmr.msra.gmra.mrb[64].mxu1 %vm2458_vm5, %v2920_v57 }
 0x2bd   : > { %4961 = vmatpush3.bf16.msra.mxu1 %v5403_v59  ;;  %4952 = vmatprep.mubr.msk.bf16.mxu1 %vm5513_vm6, %v5512_v17 }
 0x2be   : > { %4962 = vmatprep.subr.bf16.mxu1 %v5512_v17 }
 0x2c1   : > { %4963 = vmatpush3.bf16.msra.mxu1 %v5404_v58 }
 0x2c2   : > { %4964 = vmatprep.subr.bf16.mxu1 %v5512_v17 }
 0x2c4   : > { %4953 = vmatmul.mubr.msk.bf16.gmra.mrb[68].mxu1 %vm2458_vm5, %v2921_v3 }
 0x2c5   : > { %4965 = vmatpush3.bf16.msra.mxu1 %v5405_v16  ;;  %4956 = vmatprep.mubr.msk.bf16.mxu1 %vm5513_vm6, %v5512_v17 }
 0x2c6   : > { %4966 = vmatprep.subr.bf16.mxu1 %v5512_v17 }
 0x2c9   : > { %4967 = vmatpush3.bf16.msra.mxu1 %v5406_v15 }
 0x2ca   : > { %4980 = vmatprep.subr.bf16.mxu1 %v5512_v17 }
 0x2cc   : > { %4957 = vmatmul.mubr.msk.bf16.gmra.mrb[72].mxu1 %vm2458_vm5, %v2922_v35 }
 0x2cd   : > { %4968 = vmatprep.mubr.msk.bf16.mxu1 %vm5513_vm6, %v5512_v17 }
 0x2d4   : > { %4969 = vmatmul.mubr.msk.bf16.vlgmr.msra.gmra.mrb[76].mxu1 %vm2458_vm5, %v3029_v14  ;;  %v5411_v14 = vld [vmem:[%s7000_s3 + $0xc0] sm:$0xff]  }
 0x2d5   : > { %4981 = vmatpush3.bf16.msra.mxu1 %v5407_v53  ;;  %4972 = vmatprep.mubr.msk.bf16.mxu1 %vm5513_vm6, %v5512_v17 }
 0x2d6   : > { %4982 = vmatprep.subr.bf16.mxu1 %v5512_v17 }
 0x2d9   : > { %4983 = vmatpush3.bf16.msra.mxu1 %v5408_v43  ;;  %v5423_v43 = vld [vmem:[%s7002_s5 + $0x20] sm:$0xff]  }
 0x2da   : > { %4984 = vmatprep.subr.bf16.mxu1 %v5512_v17 }
 0x2dc   : > { %4973 = vmatmul.mubr.msk.bf16.gmra.mrb[80].mxu1 %vm2458_vm5, %v3030_v9  ;;  %v3359_v9 = vpack.c.bf16 %v3356_v6, %v3356_v6 }
 0x2dd   : > { %4985 = vmatpush3.bf16.msra.mxu1 %v5409_v32  ;;  %4976 = vmatprep.mubr.msk.bf16.mxu1 %vm5513_vm6, %v5512_v17 }
 0x2de   : > { %4986 = vmatprep.subr.bf16.mxu1 %v5512_v17 }
 0x2e1   : > { %4987 = vmatpush3.bf16.msra.mxu1 %v5410_v37 }
 0x2e2   : > { %5000 = vmatprep.subr.bf16.mxu1 %v5512_v17 }
 0x2e4   : > { %4977 = vmatmul.mubr.msk.bf16.gmra.mrb[84].mxu1 %vm2458_vm5, %v3031_v5 }
 0x2e5   : > { %4988 = vmatprep.mubr.msk.bf16.mxu1 %vm5513_vm6, %v5512_v17 }
 0x2ec   : > { %4989 = vmatmul.mubr.msk.bf16.vlgmr.msra.gmra.mrb[88].mxu1 %vm2458_vm5, %v3138_v20  ;;  %v5415_v20 = vld [vmem:[%s7000_s3 + $0xe0] sm:$0xff]  }
 0x2ed   : > { %5001 = vmatpush3.bf16.msra.mxu1 %v5411_v14  ;;  %4992 = vmatprep.mubr.msk.bf16.mxu1 %vm5513_vm6, %v5512_v17 }
 0x2ee   : > { %5002 = vmatprep.subr.bf16.mxu1 %v5512_v17 }
 0x2f1   : > { %5003 = vmatpush3.bf16.msra.mxu1 %v5412_v42  ;;  %v5424_v42 = vld [vmem:[%s7002_s5 + $0x28] sm:$0xff]  }
 0x2f2   : > { %5004 = vmatprep.subr.bf16.mxu1 %v5512_v17 }
 0x2f4   : > { %4993 = vmatmul.mubr.msk.bf16.gmra.mrb[92].mxu1 %vm2458_vm5, %v3139_v7  ;;  %v3465_v7 = vld [vmem:[#allocation2 + $0x62] sm:$0xff] }
 0x2f5   : > { %5005 = vmatpush3.bf16.msra.mxu1 %v5413_v54  ;;  %4996 = vmatprep.mubr.msk.bf16.mxu1 %vm5513_vm6, %v5512_v17  ;;  %v3468_v11 = vpack.c.bf16 %v3465_v7, %v3465_v7 }
 0x2f6   : > { %5006 = vmatprep.subr.bf16.mxu1 %v5512_v17 }
 0x2f9   : > { %5007 = vmatpush3.bf16.msra.mxu1 %v5414_v45 }
 0x2fa   : > { %5020 = vmatprep.subr.bf16.mxu1 %v5512_v17 }
 0x2fc   : > { %4997 = vmatmul.mubr.msk.bf16.gmra.mrb[96].mxu1 %vm2458_vm5, %v3140_v40 }
 0x2fd   : > { %5008 = vmatprep.mubr.msk.bf16.mxu1 %vm5513_vm6, %v5512_v17 }
 0x304   : > { %5009 = vmatmul.mubr.msk.bf16.vlgmr.msra.gmra.mrb[100].mxu1 %vm2458_vm5, %v6630_v29 }
 0x305   : > { %5021 = vmatpush3.bf16.msra.mxu1 %v5415_v20  ;;  %5012 = vmatprep.mubr.msk.bf16.mxu1 %vm5513_vm6, %v5512_v17 }
 0x306   : > { %5022 = vmatprep.subr.bf16.mxu1 %v5512_v17 }
 0x309   : > { %5023 = vmatpush3.bf16.msra.mxu1 %v5416_v33  ;;  %v5425_v33 = vld [vmem:[%s7002_s5 + $0x30] sm:$0xff]  }
 0x30a   : > { %5024 = vmatprep.subr.bf16.mxu1 %v5512_v17 }
 0x30c   : > { %5013 = vmatmul.mubr.msk.bf16.gmra.mrb[104].mxu1 %vm2458_vm5, %v3249_v41 }
 0x30d   : > { %5025 = vmatpush3.bf16.msra.mxu1 %v5417_v34  ;;  %5016 = vmatprep.mubr.msk.bf16.mxu1 %vm5513_vm6, %v5512_v17 }
 0x30e   : > { %5026 = vmatprep.subr.bf16.mxu1 %v5512_v17 }
 0x311   : > { %5027 = vmatpush3.bf16.msra.mxu1 %v5418_v51 }
 0x312   : > { %5040 = vmatprep.subr.bf16.mxu1 %v5512_v17 }
 0x314   : > { %5017 = vmatmul.mubr.msk.bf16.gmra.mrb[108].mxu1 %vm2458_vm5, %v3250_v56 }
 0x315   : > { %5028 = vmatprep.mubr.msk.bf16.mxu1 %vm5513_vm6, %v5512_v17 }
 0x31c   : > { %5029 = vmatmul.mubr.msk.bf16.vlgmr.msra.gmra.mrb[112].mxu1 %vm2458_vm5, %v6556_v62  ;;  %v5422_v62 = vld [vmem:[%s7000_s3 + $0x118] sm:$0xff]  }
 0x31d   : > { %5041 = vmatpush3.bf16.msra.mxu1 %v5419_v10  ;;  %5032 = vmatprep.mubr.msk.bf16.mxu1 %vm5513_vm6, %v5512_v17 }
 0x31e   : > { %5042 = vmatprep.subr.bf16.mxu1 %v5512_v17 }
 0x321   : > { %5043 = vmatpush3.bf16.msra.mxu1 %v5420_v18 }
 0x322   : > { %5044 = vmatprep.subr.bf16.mxu1 %v5512_v17 }
 0x324   : > { %5033 = vmatmul.mubr.msk.bf16.gmra.mrb[116].mxu1 %vm2458_vm5, %v3358_v27 }
 0x325   : > { %5045 = vmatpush3.bf16.msra.mxu1 %v5421_v2  ;;  %5036 = vmatprep.mubr.msk.bf16.mxu1 %vm5513_vm6, %v5512_v17 }
 0x326   : > { %5046 = vmatprep.subr.bf16.mxu1 %v5512_v17 }
 0x329   : > { %5047 = vmatpush3.bf16.msra.mxu1 %v5422_v62 }
 0x32a   : > { %5060 = vmatprep.subr.bf16.mxu1 %v5512_v17 }
 0x32c   : > { %5037 = vmatmul.mubr.msk.bf16.gmra.mrb[120].mxu1 %vm2458_vm5, %v3359_v9 }
 0x32d   : > { %5048 = vmatprep.mubr.msk.bf16.mxu1 %vm5513_vm6, %v5512_v17 }
 0x334   : > { %5049 = vmatmul.mubr.msk.bf16.vlgmr.msra.gmra.mrb[124].mxu1 %vm2458_vm5, %v6663_v63 }
 0x335   : > { %5052 = vmatprep.mubr.msk.bf16.mxu1 %vm5513_vm6, %v5512_v17  ;;  %5061 = vmatpush3.bf16.msra.mxu1 %v5423_v43 }
 0x336   : > { %5062 = vmatprep.subr.bf16.mxu1 %v5512_v17 }
 0x339   : > { %5063 = vmatpush3.bf16.msra.mxu1 %v5424_v42 }
 0x33a   : > { %5064 = vmatprep.subr.bf16.mxu1 %v5512_v17 }
 0x33c   : > { %5053 = vmatmul.mubr.msk.bf16.gmra.mrb[128].mxu1 %vm2458_vm5, %v3467_v55 }
 0x33d   : > { %5056 = vmatprep.mubr.msk.bf16.mxu1 %vm5513_vm6, %v5512_v17  ;;  %5065 = vmatpush3.bf16.msra.mxu1 %v5425_v33 }
 0x33e   : > { %5066 = vmatprep.subr.bf16.mxu1 %v5512_v17 }
 0x33f   : > { %v2696_v47 = vpop.f32.mrb[28].mxu1 }
 0x340   : > { %v4890_v60 = vpop.f32.mrb[29].mxu1 }
 0x341   : > { %v2699_v23 = vpop.f32.mrb[30].mxu1  ;;  %5067 = vmatpush3.bf16.msra.mxu1 %v5426_v13 }
 0x342   : > { %v4891_v28 = vpop.f32.mrb[31].mxu1  ;;  %5072 = vmatprep.subr.bf16.mxu1 %v5512_v17 }
 0x344   : > { %5057 = vmatmul.mubr.msk.bf16.gmra.mrb[132].mxu1 %vm2458_vm5, %v3468_v11 }
 0x345   : > { %5068 = vmatprep.mubr.msk.bf16.mxu1 %vm5513_vm6, %v5512_v17 }
 0x34f   : > { %v2704_v46 = vpop.f32.mrb[32].mxu1 }
 0x350   : > { %v4894_v12 = vpop.f32.mrb[33].mxu1 }
 0x351   : > { %v2707_v44 = vpop.f32.mrb[34].mxu1 }
 0x352   : > { %v4895_v61 = vpop.f32.mrb[35].mxu1 }
 0x357   : > { %v2712_v21 = vpop.f32.mrb[36].mxu1 }
 0x358   : > { %v4898_v25 = vpop.f32.mrb[37].mxu1 }
 0x359   : > { %v2714_v19 = vpop.f32.mrb[38].mxu1 }
 0x35a   : > { %v4899_v26 = vpop.f32.mrb[39].mxu1 }
 0x35f   : > { %v2784_v31 = vpop.f32.mrb[40].mxu1 }
 0x360   : > { %v2785_v48 = vadd.f32 %v2784_v31, %v2696_v47  ;;  %v4910_v41 = vpop.f32.mrb[41].mxu1 }
 0x361   : > { %v2787_v27 = vpop.f32.mrb[42].mxu1 }
 0x362   : > { %v2788_v55 = vadd.f32 %v2787_v27, %v2699_v23  ;;  %v4911_v1 = vpop.f32.mrb[43].mxu1 }
 0x367   : > { %v2792_v50 = vpop.f32.mrb[44].mxu1 }
 0x368   : > { %v2793_v4 = vadd.f32 %v2792_v50, %v2704_v46  ;;  %v4914_v30 = vpop.f32.mrb[45].mxu1 }
 0x369   : > { %v2795_v29 = vpop.f32.mrb[46].mxu1 }
 0x36a   : > { %v2796_v36 = vadd.f32 %v2795_v29, %v2707_v44  ;;  %v4915_v0 = vpop.f32.mrb[47].mxu1 }
 0x36f   : > { %v2800_v22 = vpop.f32.mrb[48].mxu1 }
 0x370   : > { %v4918_v39 = vpop.f32.mrb[49].mxu1 }
 0x371   : > { %v2802_v38 = vpop.f32.mrb[50].mxu1 }
 0x372   : > { %v4919_v49 = vpop.f32.mrb[51].mxu1 }
 0x377   : > { %v2889_v24 = vpop.f32.mrb[52].mxu1 }
 0x378   : > { %v2910_v63 = vadd.f32 %v2889_v24, %v2785_v48  ;;  %v4930_v8 = vpop.f32.mrb[53].mxu1 }
 0x379   : > { %v2892_v52 = vpop.f32.mrb[54].mxu1 }
 0x37a   : > { %v2911_v59 = vadd.f32 %v2892_v52, %v2788_v55  ;;  %v4931_v57 = vpop.f32.mrb[55].mxu1 }
 0x37f   : > { %v2897_v58 = vpop.f32.mrb[56].mxu1 }
 0x380   : > { %v2912_v16 = vadd.f32 %v2897_v58, %v2793_v4  ;;  %v4934_v3 = vpop.f32.mrb[57].mxu1 }
 0x381   : > { %v2900_v15 = vpop.f32.mrb[58].mxu1 }
 0x382   : > { %v2913_v35 = vadd.f32 %v2900_v15, %v2796_v36  ;;  %v4935_v53 = vpop.f32.mrb[59].mxu1 }
 0x387   : > { %v2905_v32 = vpop.f32.mrb[60].mxu1 }
 0x388   : > { %v4938_v37 = vpop.f32.mrb[61].mxu1 }
 0x389   : > { %v2907_v5 = vpop.f32.mrb[62].mxu1 }
 0x38a   : > { %v4939_v14 = vpop.f32.mrb[63].mxu1 }
 0x38f   : > { %v2999_v54 = vpop.f32.mrb[64].mxu1 }
 0x390   : > { %v3020_v45 = vadd.f32 %v2999_v54, %v2910_v63  ;;  %v4950_v40 = vpop.f32.mrb[65].mxu1 }
 0x391   : > { %v3002_v20 = vpop.f32.mrb[66].mxu1 }
 0x392   : > { %v3021_v34 = vadd.f32 %v3002_v20, %v2911_v59  ;;  %v4951_v51 = vpop.f32.mrb[67].mxu1 }
 0x397   : > { %v3007_v56 = vpop.f32.mrb[68].mxu1 }
 0x398   : > { %v3022_v10 = vadd.f32 %v3007_v56, %v2912_v16  ;;  %v4954_v18 = vpop.f32.mrb[69].mxu1 }
 0x399   : > { %v3010_v2 = vpop.f32.mrb[70].mxu1 }
 0x39a   : > { %v3023_v62 = vadd.f32 %v3010_v2, %v2913_v35  ;;  %v4955_v6 = vpop.f32.mrb[71].mxu1 }
 0x39f   : > { %v3015_v9 = vpop.f32.mrb[72].mxu1 }
 0x3a0   : > { %v4958_v47 = vpop.f32.mrb[73].mxu1 }
 0x3a1   : > { %v3017_v7 = vpop.f32.mrb[74].mxu1 }
 0x3a2   : > { %v4959_v60 = vpop.f32.mrb[75].mxu1 }
 0x3a7   : > { %v3108_v23 = vpop.f32.mrb[76].mxu1 }
 0x3a8   : > { %v3129_v28 = vadd.f32 %v3108_v23, %v3020_v45  ;;  %v4970_v11 = vpop.f32.mrb[77].mxu1 }
 0x3a9   : > { %v3111_v46 = vpop.f32.mrb[78].mxu1  ;;  %v4334_v11 = vld [vmem:[%s7001_s4] ss:$0 sm:$0xff] }
 0x3aa   : > { %v3130_v12 = vadd.f32 %v3111_v46, %v3021_v34  ;;  %v4971_v44 = vpop.f32.mrb[79].mxu1 }
 0x3af   : > { %v3116_v61 = vpop.f32.mrb[80].mxu1 }
 0x3b0   : > { %v3131_v21 = vadd.f32 %v3116_v61, %v3022_v10  ;;  %v4974_v25 = vpop.f32.mrb[81].mxu1 }
 0x3b1   : > { %v3119_v19 = vpop.f32.mrb[82].mxu1 }
 0x3b2   : > { %v3132_v26 = vadd.f32 %v3119_v19, %v3023_v62  ;;  %v4975_v31 = vpop.f32.mrb[83].mxu1 }
 0x3b7   : > { %v3124_v48 = vpop.f32.mrb[84].mxu1 }
 0x3b8   : > { %v4978_v41 = vpop.f32.mrb[85].mxu1 }
 0x3b9   : > { %v3126_v27 = vpop.f32.mrb[86].mxu1 }
 0x3ba   : > { %v4979_v55 = vpop.f32.mrb[87].mxu1 }
 0x3bf   : > { %v3217_v1 = vpop.f32.mrb[88].mxu1 }
 0x3c0   : > { %v3238_v50 = vadd.f32 %v3217_v1, %v3129_v28  ;;  %v4990_v4 = vpop.f32.mrb[89].mxu1 }
 0x3c1   : > { %v3220_v30 = vpop.f32.mrb[90].mxu1 }
 0x3c2   : > { %v3239_v29 = vadd.f32 %v3220_v30, %v3130_v12  ;;  %v4991_v36 = vpop.f32.mrb[91].mxu1 }
 0x3c7   : > { %v3225_v0 = vpop.f32.mrb[92].mxu1 }
 0x3c8   : > { %v3240_v22 = vadd.f32 %v3225_v0, %v3131_v21  ;;  %v4994_v39 = vpop.f32.mrb[93].mxu1 }
 0x3c9   : > { %v3228_v38 = vpop.f32.mrb[94].mxu1 }
 0x3ca   : > { %v3241_v49 = vadd.f32 %v3228_v38, %v3132_v26  ;;  %v4995_v24 = vpop.f32.mrb[95].mxu1 }
 0x3cb   : > { %v5427_v24 = vld [vmem:[%s7002_s5] sm:$0xff]  }
 0x3cf   : > { %v3233_v63 = vpop.f32.mrb[96].mxu1 }
 0x3d0   : > { %v4998_v8 = vpop.f32.mrb[97].mxu1 }
 0x3d1   : > { %v3235_v52 = vpop.f32.mrb[98].mxu1 }
 0x3d2   : > { %v4999_v59 = vpop.f32.mrb[99].mxu1 }
 0x3d7   : > { %v3327_v57 = vpop.f32.mrb[100].mxu1 }
 0x3d8   : > { %v3348_v58 = vadd.f32 %v3327_v57, %v3238_v50  ;;  %v5010_v16 = vpop.f32.mrb[101].mxu1 }
 0x3d9   : > { %v3330_v3 = vpop.f32.mrb[102].mxu1  ;;  %v5429_v16 = vld [vmem:[%s7002_s5 + $0x10] sm:$0xff]  }
 0x3da   : > { %v3349_v15 = vadd.f32 %v3330_v3, %v3239_v29  ;;  %v5011_v35 = vpop.f32.mrb[103].mxu1  ;;  %v5430_v3 = vld [vmem:[%s7002_s5 + $0x18] sm:$0xff]  }
 0x3db   : > { %v5432_v35 = vld [vmem:[%s7002_s5 + $0x48] sm:$0xff]  }
 0x3df   : > { %v3335_v53 = vpop.f32.mrb[104].mxu1 }
 0x3e0   : > { %v3350_v43 = vadd.f32 %v3335_v53, %v3240_v22  ;;  %v5014_v32 = vpop.f32.mrb[105].mxu1  ;;  %v5433_v53 = vld [vmem:[%s7002_s5 + $0x50] sm:$0xff]  }
 0x3e1   : > { %v3338_v37 = vpop.f32.mrb[106].mxu1  ;;  %v5434_v32 = vld [vmem:[%s7002_s5 + $0x58] sm:$0xff]  }
 0x3e2   : > { %v3351_v5 = vadd.f32 %v3338_v37, %v3241_v49  ;;  %v5015_v14 = vpop.f32.mrb[107].mxu1 }
 0x3e7   : > { %v3343_v42 = vpop.f32.mrb[108].mxu1 }
 0x3e8   : > { %v5018_v54 = vpop.f32.mrb[109].mxu1  ;;  %v5436_v42 = vld [vmem:[%s7002_s5 + $0x68] sm:$0xff]  }
 0x3e9   : > { %v3345_v45 = vpop.f32.mrb[110].mxu1  ;;  %v5437_v54 = vld [vmem:[%s7002_s5 + $0x70] sm:$0xff]  }
 0x3ea   : > { %v5019_v40 = vpop.f32.mrb[111].mxu1  ;;  %v5438_v45 = vld [vmem:[%s7002_s5 + $0x78] sm:$0xff]  }
 0x3ef   : > { %v3436_v20 = vpop.f32.mrb[112].mxu1 }
 0x3f0   : > { %v3457_v33 = vadd.f32 %v3436_v20, %v3348_v58  ;;  %v5030_v34 = vpop.f32.mrb[113].mxu1  ;;  %v5428_v58 = vld [vmem:[%s7002_s5 + $0x8] sm:$0xff]   ;;  %v5439_v20 = vld [vmem:[%s7004_s7] sm:$0xff]  }
 0x3f1   : > { %v3439_v51 = vpop.f32.mrb[114].mxu1  ;;  %v5441_v34 = vld [vmem:[%s7004_s7 + $0x10] sm:$0xff]  }
 0x3f2   : > { %v3458_v13 = vadd.f32 %v3439_v51, %v3349_v15  ;;  %v5031_v56 = vpop.f32.mrb[115].mxu1  ;;  %v5431_v15 = vld [vmem:[%s7002_s5 + $0x40] sm:$0xff]   ;;  %v5442_v51 = vld [vmem:[%s7004_s7 + $0x18] sm:$0xff]  }
 0x3f7   : > { %v3444_v10 = vpop.f32.mrb[116].mxu1 }
 0x3f8   : > { %v3459_v18 = vadd.f32 %v3444_v10, %v3350_v43  ;;  %v5034_v2 = vpop.f32.mrb[117].mxu1 }
 0x3f9   : > { %v3447_v62 = vpop.f32.mrb[118].mxu1 }
 0x3fa   : > { %v3460_v6 = vadd.f32 %v3447_v62, %v3351_v5  ;;  %v5035_v9 = vpop.f32.mrb[119].mxu1  ;;  %v5435_v5 = vld [vmem:[%s7002_s5 + $0x60] sm:$0xff]  }
 0x3ff   : > { %v3452_v47 = vpop.f32.mrb[120].mxu1 }
 0x400   : > { %v5038_v7 = vpop.f32.mrb[121].mxu1 }
 0x401   : > { %v3454_v60 = vpop.f32.mrb[122].mxu1 }
 0x402   : > { %v5039_v23 = vpop.f32.mrb[123].mxu1 }
 0x407   : > { %v3545_v28 = vpop.f32.mrb[124].mxu1 }
 0x408   : > { %v3566_v46 = vadd.f32 %v3545_v28, %v3457_v33  ;;  %v5050_v12 = vpop.f32.mrb[125].mxu1  ;;  %v5440_v33 = vld [vmem:[%s7004_s7 + $0x8] sm:$0xff]  }
 0x409   : > { %v3548_v44 = vpop.f32.mrb[126].mxu1 }
 0x40a   : > { %v3577_v61 = vadd.f32 %v4334_v11, %v3566_v46  ;;  %v3567_v21 = vadd.f32 %v3548_v44, %v3458_v13  ;;  %v5051_v25 = vpop.f32.mrb[127].mxu1  ;;  %v3906_v46 = vld [vmem:[%s7003_s6] sm:$0x1] }
 0x40c   : > { %v3578_v19 = vadd.f32 %v4334_v11, %v3567_v21  ;;  %v3581_v26 = vmax.f32 %v3577_v61, 0.0 }
 0x40e   : > { %v3582_v31 = vmax.f32 %v3578_v19, 0.0 }
 0x40f   : > { %v3553_v48 = vpop.f32.mrb[128].mxu1 }
 0x410   : > { %v3585_v41 = vmax.f32 %v3581_v26, %v3582_v31  ;;  %v3568_v27 = vadd.f32 %v3553_v48, %v3459_v18  ;;  %v5054_v55 = vpop.f32.mrb[129].mxu1  ;;  %v3918_v31 = vld [vmem:[%s7005_s8] sm:$0x1] }
 0x411   : > { %v3556_v1 = vpop.f32.mrb[130].mxu1 }
 0x412   : > { %v3588_v50 = vrot.slane %v3585_v41, 1  ;;  %v3579_v4 = vadd.f32 %v4334_v11, %v3568_v27  ;;  %v3569_v30 = vadd.f32 %v3556_v1, %v3460_v6  ;;  %v5055_v29 = vpop.f32.mrb[131].mxu1 }
 0x414   : > { %v3590_v36 = vmax.f32 %v3585_v41, %v3588_v50  ;;  %v3580_v0 = vadd.f32 %v4334_v11, %v3569_v30  ;;  %v3583_v39 = vmax.f32 %v3579_v4, 0.0 }
 0x416   : > { %v3595_v22 = vpack.c.bf16 %v3590_v36, %v3590_v36  ;;  %v3584_v38 = vmax.f32 %v3580_v0, 0.0 }
 0x417   : > { %v3561_v49 = vpop.f32.mrb[132].mxu1 }
 0x418   : > { %v3614_v63 = vrot.slane %v3595_v22, 1  ;;  %v3586_v8 = vmax.f32 %v3583_v39, %v3584_v38  ;;  %v5058_v52 = vpop.f32.mrb[133].mxu1 }
 0x419   : > { %v3563_v59 = vpop.f32.mrb[134].mxu1 }
 0x41a   : > { %v5059_v57 = vpop.f32.mrb[135].mxu1  ;;  %5069 = vmatmul.mubr.msk.bf16.vlgmr.msra.gmra.mrb[136].mxu1 %vm2458_vm5, %v3614_v63  ;;  %v3592_v43 = vrot.slane %v3586_v8, 1 }
 0x41b   : > { %5073 = vmatpush3.bf16.msra.mxu1 %v5427_v24  ;;  %5080 = vmatprep.mubr.msk.bf16.mxu1 %vm5513_vm6, %v5512_v17 }
 0x41c   : > { %5074 = vmatprep.subr.bf16.mxu1 %v5512_v17  ;;  %v3594_v37 = vmax.f32 %v3586_v8, %v3592_v43 }
 0x41e   : > { %v3749_v14 = vpack.c.bf16 %v3594_v37, %v3594_v37 }
 0x41f   : > { %5075 = vmatpush3.bf16.msra.mxu1 %v5428_v58 }
 0x420   : > { %5076 = vmatprep.subr.bf16.mxu1 %v5512_v17  ;;  %v3837_v40 = vrot.slane %v3749_v14, 1 }
 0x423   : > { %5077 = vmatpush3.bf16.msra.mxu1 %v5429_v16 }
 0x424   : > { %5078 = vmatprep.subr.bf16.mxu1 %v5512_v17 }
 0x427   : > { %5079 = vmatpush3.bf16.msra.mxu1 %v5430_v3 }
 0x428   : > { %5084 = vmatprep.subr.bf16.mxu1 %v5512_v17 }
 0x42a   : > { %5081 = vmatmul.mubr.msk.bf16.vlgmr.msra.gmra.mrb[140].mxu1 %vm2458_vm5, %v3595_v22 }
 0x42b   : > { %5085 = vmatpush3.bf16.msra.mxu1 %v5431_v15  ;;  %5092 = vmatprep.mubr.msk.bf16.mxu1 %vm5513_vm6, %v5512_v17 }
 0x42c   : > { %5086 = vmatprep.subr.bf16.mxu1 %v5512_v17 }
 0x42f   : > { %5087 = vmatpush3.bf16.msra.mxu1 %v5432_v35 }
 0x430   : > { %5088 = vmatprep.subr.bf16.mxu1 %v5512_v17 }
 0x433   : > { %5089 = vmatpush3.bf16.msra.mxu1 %v5433_v53 }
 0x434   : > { %5090 = vmatprep.subr.bf16.mxu1 %v5512_v17 }
 0x437   : > { %5091 = vmatpush3.bf16.msra.mxu1 %v5434_v32 }
 0x438   : > { %5096 = vmatprep.subr.bf16.mxu1 %v5512_v17 }
 0x43a   : > { %5093 = vmatmul.mubr.msk.bf16.vlgmr.msra.gmra.mrb[144].mxu1 %vm2458_vm5, %v3749_v14 }
 0x43b   : > { %5097 = vmatpush3.bf16.msra.mxu1 %v5435_v5  ;;  %5104 = vmatprep.mubr.msk.bf16.mxu1 %vm5513_vm6, %v5512_v17 }
 0x43c   : > { %5098 = vmatprep.subr.bf16.mxu1 %v5512_v17 }
 0x43f   : > { %5099 = vmatpush3.bf16.msra.mxu1 %v5436_v42 }
 0x440   : > { %5100 = vmatprep.subr.bf16.mxu1 %v5512_v17 }
 0x443   : > { %5101 = vmatpush3.bf16.msra.mxu1 %v5437_v54 }
 0x444   : > { %5102 = vmatprep.subr.bf16.mxu1 %v5512_v17 }
 0x447   : > { %5103 = vmatpush3.bf16.msra.mxu1 %v5438_v45 }
 0x448   : > { %5108 = vmatprep.subr.bf16.mxu1 %v5512_v17 }
 0x44a   : > { %5105 = vmatmul.mubr.msk.bf16.vlgmr.msra.gmra.mrb[148].mxu1 %vm2458_vm5, %v3837_v40 }
 0x44b   : > { %5116 = vmatprep.mubr.msk.bf16.mxu1 %vm5513_vm6, %v5512_v17  ;;  %5109 = vmatpush3.bf16.msra.mxu1 %v5439_v20 }
 0x44c   : > { %5110 = vmatprep.subr.bf16.mxu1 %v5512_v17 }
 0x44f   : > { %5111 = vmatpush3.bf16.msra.mxu1 %v5440_v33 }
 0x450   : > { %5112 = vmatprep.subr.bf16.mxu1 %v5512_v17 }
 0x453   : > { %5113 = vmatpush3.bf16.msra.mxu1 %v5441_v34 }
 0x454   : > { %5114 = vmatprep.subr.bf16.mxu1 %v5512_v17 }
 0x457   : > { %5115 = vmatpush3.bf16.msra.mxu1 %v5442_v51 }
 0x4ed   : > { %v3676_v13 = vpop.f32.mrb[136].mxu1 }
 0x4ee   : > { %v5070_v56 = vpop.f32.mrb[137].mxu1 }
 0x4ef   : > { %v3679_v10 = vpop.f32.mrb[138].mxu1 }
 0x4f0   : > { %v5071_v18 = vpop.f32.mrb[139].mxu1 }
 0x4fd   : > { %v3743_v2 = vpop.f32.mrb[140].mxu1 }
 0x4fe   : > { %v3744_v62 = vadd.f32 %v3743_v2, %v3676_v13  ;;  %v5082_v6 = vpop.f32.mrb[141].mxu1 }
 0x4ff   : > { %v3746_v9 = vpop.f32.mrb[142].mxu1 }
 0x500   : > { %v5083_v47 = vpop.f32.mrb[143].mxu1 }
 0x50d   : > { %v3820_v7 = vpop.f32.mrb[144].mxu1 }
 0x50e   : > { %v3826_v60 = vadd.f32 %v3820_v7, %v3744_v62  ;;  %v5094_v23 = vpop.f32.mrb[145].mxu1 }
 0x50f   : > { %v3823_v28 = vpop.f32.mrb[146].mxu1 }
 0x510   : > { %v5095_v11 = vpop.f32.mrb[147].mxu1 }
 0x51d   : > { %v3899_v17 = vpop.f32.mrb[148].mxu1 }
 0x51e   : > { %v3905_v12 = vadd.f32 %v3899_v17, %v3826_v60  ;;  %v5106_v44 = vpop.f32.mrb[149].mxu1 }
 0x51f   : > { %v3902_v61 = vpop.f32.mrb[150].mxu1 }
 0x520   : > { %v3907_v21 = vadd.f32 %v3906_v46, %v3905_v12  ;;  %v5107_v25 = vpop.f32.mrb[151].mxu1 }
 0x522   : > { %v3908_v19 = vmax.f32 %v3907_v21, 0.0 }
 0x524   : > { %v3909_v26 = vpack.c.bf16 %v3908_v19, %v3908_v19 }
 0x526   : > { %5117 = vmatmul.mubr.msk.bf16.vlgmr.msra.gmra.mrb[152].mxu1 %vm2458_vm5, %v3909_v26 }
 0x5f9   : > { %v3980_v48 = vpop.f32.mrb[152].mxu1 }
 0x5fa   : > { %v3981_v41 = vadd.f32 %v3980_v48, %v3918_v31  ;;  %v5118_v27 = vpop.f32.mrb[153].mxu1 }
 0x5fb   : > { %v3983_v55 = vpop.f32.mrb[154].mxu1 }
 0x5fc   : > { %v5119_v1 = vpop.f32.mrb[155].mxu1  ;;  %v3987_v50 = vsel %vm3986_vm11, %v3981_v41, -inf }
 0x5fd   : > { %3988 = vmax.xlane.f32.xlu0 %v3987_v50 }
 0x68a   : > { %v3989_v4 = vpop.xlane.xlu0 %3988 }
 0x68b   : > { %v3990_v30 = vsub.f32 %v3981_v41, %v3989_v4 }
 0x68d   : > { %v3991_v29 = vmul.f32 1.442695, %v3990_v30 }
 0x68f   : > { %5443 = vpow2.f32 %v3991_v29 }
 0x699   : > { %v5444_v36 = vpop.eup %5443 }
 0x69a   : > { %v3993_v0 = vsel %vm3986_vm11, %v5444_v36, 0.0 }
 0x69b   : > { %3994 = vadd.xlane.f32.xlu0 %v3993_v0 }
 0x728   : > { %v3995_v22 = vpop.xlane.xlu0 %3994 }
 0x729   : > { %5445 = vrcp.f32 %v3995_v22 }
 0x733   : > { %v5446_v39 = vpop.eup %5445 }
 0x734   : > { %v3997_v38 = vmul.f32 %v5446_v39, %v5444_v36 }
 0x736   : > { %3998 = vst.msk [vmem:[%s324_s22] sm:$0x1] %vm3986_vm11, %v3997_v38 }
 0x737   : > { %5460 = shalt.err (!%p5457_p3)
}
 0x738   : > { %s5461_s17 = scalar_lea.hbm %s6954_s26, 16  ;;  %s5465_s22 = scalar_lea.hbm %s7006_s9, 32 }
 0x739   : > { %p5462_p4 = scmp.ne.s32.totalorder %s6954_s26, %s5461_s17  ;;  %p5466_p9 = scmp.lt.u32.totalorder %s6954_s26, %s7006_s9 }
 0x73a   : > { %p5467_p10 = scmp.lt.u32.totalorder %s5465_s22, %s5461_s17  ;;  %p5469_p12 = scmp.lt.u32.totalorder %s5461_s17, %s6954_s26 }
 0x73b   : > { %p5463_p7 = pnand %p5462_p4, %p5603_p5 }
 0x73c   : > { %p5468_p11 = por %p5467_p10, %p5466_p9 }
 0x73d   : > { %p5464_p8 = pneg %p5463_p7 }
 0x73e   : > { %p5470_p13 = por %p5469_p12, %p5468_p11 }
 0x740   : > { %p5471_p0 = pnand %p5470_p13, %p5464_p8 }
 0x742   : > { %5474 = shalt.err (!%p5471_p0)
}
 0x743   : > { %5345 = dma.vmem_to_hbm [thread:$0]  (%p5603_p5), %s6956_s23, 16, %s6954_s26, %s4000_s27  }
 0x744 PF: > { %p5351_p1 = scmp.ge.s32.totalorder %s5509_s12, 2  ;;  %s4024_s28 = sand.u32 1, %s5497_s30  }
 0x745   : > { %s4025_s13 = scalar_lea.sflag [#allocation4], %s4024_s28 }
 0x746   : > { %p5348_p2 = pnand %p5351_p1, %p5607_p6 }
 0x748   : > { %5492 = dma.done.wait (!%p5348_p2), %s4025_s13, 16  }
 0x749   : > { %5494 = vsyncadd (!%p5348_p2), %s4025_s13, 4294967280  ;;  %p19_p3 = scmp.ge.s32.totalorder %s5590_s15, 4   ;;  %s7056_s30 = smov %s5501_s10 }
 0x74a   : > { %s7057_s10 = smov %s5505_s11  ;;  %s7058_s11 = smov %s5601_s18 }
 0x74b   : > { %s7059_s12 = smov %s5590_s15  ;;  %21 = sbr.rel (!%p19_p3) target bundleno = 3 (0x3), region = 112 }
 0x752   :  { %4029 = vsyncpa [#allocation4], 1 }
 0x753   :  { %4031 = vsyncpa [#allocation4 + $0x1], 1 }

</bundles_post_ra>
